<compile_context>
chip_gen: v7x
topology: tpu7x:2x2x1
jax: 0.10.0
libtpu: 0.0.40
codegen_flags: <defaults>
</compile_context>

<pallas_src>
import math

import jax
import jax.numpy as jnp
from jax import lax
from jax.experimental import pallas as pl
from jax.experimental.pallas import tpu as pltpu

# ----- module hyper-parameters (from config / __init__) -----
B = 2            # batch
NUM_CAPS = 8     # len(label_ids)
D = 32           # config.model.structure_encoder.dimension
CAP_DIM = 16     # config.model.capsule_setting.dimension
MAX_ROUTING_ITERS = 64   # safety bound; reference loops until convergence (~20 iterations)

BN = B * NUM_CAPS          # 16 : stacked (batch, input-capsule) rows (two 8-sublane groups)
NC = NUM_CAPS * CAP_DIM    # 128: lane-dense capsule-output width
ND = NUM_CAPS * D          # 256: flattened DALayer input width


# ---------- static selector / segment masks (built from iotas, no int div/mod) ----------
def _block_mask(rows, cols, step):
    """mask[r, c] = 1.0 iff r // step == c."""
    r = lax.broadcasted_iota(jnp.int32, (rows, cols), 0)
    c = lax.broadcasted_iota(jnp.int32, (rows, cols), 1)
    q = r - c * step
    return jnp.logical_and(q >= 0, q < step).astype(jnp.float32)


def _block_mask_t(rows, cols, step):
    """mask[r, c] = 1.0 iff c // step == r."""
    r = lax.broadcasted_iota(jnp.int32, (rows, cols), 0)
    c = lax.broadcasted_iota(jnp.int32, (rows, cols), 1)
    q = c - r * step
    return jnp.logical_and(q >= 0, q < step).astype(jnp.float32)


def _modsel_mask(rows, cols, period, nrep):
    """mask[r, c] = 1.0 iff r % period == c  (r < nrep*period)."""
    r = lax.broadcasted_iota(jnp.int32, (rows, cols), 0)
    c = lax.broadcasted_iota(jnp.int32, (rows, cols), 1)
    q = r - c
    m = (q == 0)
    for k in range(1, nrep):
        m = jnp.logical_or(m, q == k * period)
    return m.astype(jnp.float32)


# ---------- sublane-group helpers: (B*NUM_CAPS, L) <-> (B, L)  (layout-free reshapes) ----------
def _rows_to_batches(x2d):
    """(B*NUM_CAPS, L) -> (B, L): sum the NUM_CAPS rows of each batch (sublane reduce)."""
    return jnp.sum(x2d.reshape(B, NUM_CAPS, x2d.shape[-1]), axis=1)


def _batches_to_rows(x2d):
    """(B, L) -> (B*NUM_CAPS, L): replicate each batch row to its NUM_CAPS rows (sublane bcast)."""
    L = x2d.shape[-1]
    return jnp.broadcast_to(x2d[:, None, :], (B, NUM_CAPS, L)).reshape(BN, L)


def kde_capsule_kernel(xflat_ref, xs_ref, da_ref, wt_ref, bias_ref, act_ref, p_ref):
    f32 = jnp.float32

    # Lane-segment selectors (stay on the MXU; batch-dim ops moved to sublane reduce/bcast).
    G = _block_mask(NC, NUM_CAPS, CAP_DIM)            # (128, 8): segment-sum per CAP_DIM block
    GT = _block_mask_t(NUM_CAPS, NC, CAP_DIM)         # (8, 128): per-capsule scalar -> lanes
    RowSel = _modsel_mask(BN, NUM_CAPS, NUM_CAPS, B)  # (16, 8) : pick column (r mod NUM_CAPS)

    # ---- DALayer params, packed into one slab: [w1t (256,8); w2t (8,8); b1 (1,8); b2 (1,8)] ----
    w1t = da_ref[pl.ds(0, ND), :]                      # (256, 8)
    w2t = da_ref[pl.ds(ND, NUM_CAPS), :]               # (8, 8)
    bb = da_ref[pl.ds(ND + NUM_CAPS, 2), :]            # (2, 8): rows = [b1; b2]
    b1 = bb[0:1, :]
    b2 = bb[1:2, :]

    # ---- DALayer attention, batched over B: tanh(L2(relu(L1(flat)))) ----
    xflat = xflat_ref[...]                                                   # (B, N*D)
    h = jnp.maximum(jnp.dot(xflat, w1t, preferred_element_type=f32) + b1, 0.0)   # (B, N)
    a = jnp.tanh(jnp.dot(h, w2t, preferred_element_type=f32) + b2)           # (B, N)
    scale = 1.0 + a                                                          # (B, N)
    # per-(b, i) scale for the stacked (B*N, D) rows: sublane bcast + lane pick
    scale_rows = jnp.sum(_batches_to_rows(scale) * RowSel, axis=1, keepdims=True)   # (B*N, 1)

    # ---- capsule projection (one stacked matmul): p = W(x * (1 + a)) + bias  (scaler == 1.0) ----
    xa = xs_ref[...] * scale_rows                                            # (B*N, D)
    bias_rows = jnp.broadcast_to(bias_ref[...][None, :, :],
                                 (B, NUM_CAPS, NC)).reshape(BN, NC)          # tile bias over batch
    U = jnp.dot(xa, wt_ref[...], preferred_element_type=f32) + bias_rows     # (B*N, N*CAP_DIM)
    p_ref[...] = U

    # ---- loop-invariant squash(u) per CAP_DIM segment and its squared norms ----
    n2_u = jnp.dot(U * U, G, preferred_element_type=f32)                     # (B*N, N)
    fac_u = jnp.sqrt(n2_u) * pl.reciprocal(0.5 + n2_u, approx=True)          # ||.||/(0.5+||.||^2)
    US = U * jnp.dot(fac_u, GT, preferred_element_type=f32)                  # squash(u) (B*N, NC)
    n2_us = n2_u * fac_u * fac_u                                             # ||squash(u)||^2

    # ---- one KDE routing update ----
    def routing_update(coef, last):
        # softmax over N routing logits + the implicit always-zero extra logit
        m = jnp.maximum(jnp.max(coef, axis=1, keepdims=True), 0.0)           # (B*N, 1)
        e = jnp.exp(coef - m)                                                # (B*N, N)
        denom = jnp.exp(-m) + jnp.sum(e, axis=1, keepdims=True)              # (B*N, 1)
        c = e * pl.reciprocal(denom, approx=True)                            # (B*N, N)
        # s[b, j, :] = sum_i c[b, i, j] * u[b, i, j, :]  (sublane reduce over input capsules)
        cw = jnp.dot(c, GT, preferred_element_type=f32)                      # (B*N, NC)
        S = _rows_to_batches(cw * U)                                         # (B, NC)
        # v = squash(s); ||v||^2 = n2_s * fac_s^2
        n2_s = jnp.dot(S * S, G, preferred_element_type=f32)                 # (B, N)
        fac_s = jnp.sqrt(n2_s) * pl.reciprocal(0.5 + n2_s, approx=True)
        V = S * jnp.dot(fac_s, GT, preferred_element_type=f32)               # (B, NC)
        n2_v = n2_s * fac_s * fac_s                                          # (B, N)
        # d = 1 - ||squash(u) - v|| with ||.||^2 = n2_us + n2_v - 2*<squash(u), v>  (clamped >= 0)
        cross = jnp.dot(US * _batches_to_rows(V), G, preferred_element_type=f32)   # (B*N, N)
        dn2 = jnp.maximum(n2_us + _batches_to_rows(n2_v) - 2.0 * cross, 0.0)
        d = 1.0 - jnp.sqrt(dn2)
        coef_new = coef + d
        # batch-global kde statistic (same log(<=0) exposure as the reference)
        kde = jnp.log(jnp.sum(coef_new * d) * (1.0 / B))
        delta = kde - last
        conv = jnp.logical_and(delta > -0.05, delta < 0.05)
        return coef_new, n2_s, kde, conv

    # ---- KDE routing: early-exit while loop, body unrolled 2x (masked commit of update 2) ----
    def cond(state):
        it, _, _, _, done = state
        return jnp.logical_and(it < MAX_ROUTING_ITERS, done == 0)

    def body(state):
        it, coef, _, last, _ = state
        coef1, n2_s1, kde1, conv1 = routing_update(coef, last)
        coef2, n2_s2, kde2, conv2 = routing_update(coef1, kde1)
        # Second update is committed only if the first one did not converge (exact reference
        # semantics: convergence is checked after every iteration).
        coef_o = jnp.where(conv1, coef1, coef2)
        n2_o = jnp.where(conv1, n2_s1, n2_s2)
        kde_o = jnp.where(conv1, kde1, kde2)
        done = jnp.logical_or(conv1, conv2)
        return (it + 2, coef_o, n2_o, kde_o, done.astype(jnp.int32))

    init = (jnp.zeros((), jnp.int32),
            jnp.zeros((BN, NUM_CAPS), f32),
            jnp.zeros((B, NUM_CAPS), f32),
            jnp.zeros((), f32),
            jnp.zeros((), jnp.int32))
    _, _, n2_s_fin, _, _ = lax.while_loop(cond, body, init)

    # exact final activation map: ||v|| = ||s||^2 / (0.5 + ||s||^2)   (no approx reciprocal here)
    acts = n2_s_fin / (0.5 + n2_s_fin)
    act_ref[...] = jnp.clip(acts, 1e-6, 1.0 - 1e-6)


@jax.jit
def kde_capsule_forward(x, w1, b1, w2, b2, W, bias):
    """x: (B, NUM_CAPS, D). Params in torch layout:
       w1 (N, N*D), b1 (N,), w2 (N, N), b2 (N,), W (N*CAP_DIM, D), bias (1, N, N*CAP_DIM)."""
    Bz, N, Dd = x.shape
    # layout glue (host-side, tiny): two 2-D views of x, one packed DA-param slab
    xflat = x.reshape(Bz, N * Dd)                       # DALayer flatten       (B, N*D)
    xs = x.reshape(Bz * N, Dd)                          # stacked (b, i) rows   (B*N, D)
    da_slab = jnp.concatenate(
        [w1.T, w2.T, b1.reshape(1, N), b2.reshape(1, N)], axis=0)   # (N*D + N + 2, N)
    wt = W.T                                            # (D, N*CAP_DIM)
    bias2d = bias.reshape(N, N * CAP_DIM)               # (N, N*CAP_DIM), tiled over B in-kernel

    ins = (xflat, xs, da_slab, wt, bias2d)
    vmem = pl.BlockSpec(memory_space=pltpu.MemorySpace.VMEM)
    # NOTE(v7x): the kde statistic is batch-global, so this kernel is intentionally NOT split
    # across TensorCores; to use both v7x TCs, batch independent instances over a leading
    # "parallel" grid axis in a wrapper instead.
    act, p2 = pl.pallas_call(
        kde_capsule_kernel,
        in_specs=[vmem] * len(ins),
        out_specs=(vmem, vmem),
        out_shape=(jax.ShapeDtypeStruct((Bz, N), jnp.float32),
                   jax.ShapeDtypeStruct((Bz * N, N * CAP_DIM), jnp.float32)),
        cost_estimate=pl.CostEstimate(flops=3_000_000, transcendentals=16_000,
                                      bytes_accessed=48_000),
    )(*ins)

    p = p2.reshape(Bz, N, N, CAP_DIM)                   # torch .view(B, N, N, CAP_DIM), same order
    return act, p


if __name__ == "__main__":
    key = jax.random.PRNGKey(0)
    ks = jax.random.split(key, 6)

    x = jax.random.normal(ks[0], (B, NUM_CAPS, D), jnp.float32)

    # W: uniform(-1/sqrt(num_caps), 1/sqrt(num_caps)), torch Linear weight layout (out, in)
    lim_w = 1.0 / math.sqrt(NUM_CAPS)
    W = jax.random.uniform(ks[1], (CAP_DIM * NUM_CAPS, D), jnp.float32, -lim_w, lim_w)
    # bias parameter is initialized to zeros in __init__
    bias = jnp.zeros((1, NUM_CAPS, CAP_DIM * NUM_CAPS), jnp.float32)
    # DALayer linears (torch default uniform(-1/sqrt(fan_in), 1/sqrt(fan_in)))
    lim1 = 1.0 / math.sqrt(NUM_CAPS * D)
    w1 = jax.random.uniform(ks[2], (NUM_CAPS, NUM_CAPS * D), jnp.float32, -lim1, lim1)
    b1 = jax.random.uniform(ks[3], (NUM_CAPS,), jnp.float32, -lim1, lim1)
    lim2 = 1.0 / math.sqrt(NUM_CAPS)
    w2 = jax.random.uniform(ks[4], (NUM_CAPS, NUM_CAPS), jnp.float32, -lim2, lim2)
    b2 = jax.random.uniform(ks[5], (NUM_CAPS,), jnp.float32, -lim2, lim2)

    activations, p = kde_capsule_forward(x, w1, b1, w2, b2, W, bias)
    jax.block_until_ready((activations, p))
    assert activations.shape == (B, NUM_CAPS)
    assert p.shape == (B, NUM_CAPS, NUM_CAPS, CAP_DIM)
    assert bool(jnp.all(jnp.isfinite(activations)))
    assert bool(jnp.all(jnp.isfinite(p)))
    print("KERNEL_OK")
</pallas_src>

<mosaic_0001>
module attributes {stable_mosaic.version = 11 : i64} {
  func.func @kde_capsule_kernel(%arg0: memref<2x256xf32, #tpu.memory_space<vmem>>, %arg1: memref<16x32xf32, #tpu.memory_space<vmem>>, %arg2: memref<266x8xf32, #tpu.memory_space<vmem>>, %arg3: memref<32x128xf32, #tpu.memory_space<vmem>>, %arg4: memref<8x128xf32, #tpu.memory_space<vmem>>, %arg5: memref<2x8xf32, #tpu.memory_space<vmem>>, %arg6: memref<16x128xf32, #tpu.memory_space<vmem>>) attributes {dimension_semantics = [], scalar_prefetch = 0 : i64, scratch_operands = 0 : i64, tpu.core_type = #tpu.core_type<tc>} {
    %0 = tpu.iota {dimensions = array<i32: 0>} : vector<128x8xi32>
    %1 = tpu.iota {dimensions = array<i32: 1>} : vector<128x8xi32>
    %c16_i32 = arith.constant 16 : i32
    %2 = vector.broadcast %c16_i32 : i32 to vector<128x8xi32>
    %3 = arith.muli %1, %2 : vector<128x8xi32>
    %4 = arith.subi %0, %3 : vector<128x8xi32>
    %c0_i32 = arith.constant 0 : i32
    %5 = vector.broadcast %c0_i32 : i32 to vector<128x8xi32>
    %6 = arith.cmpi sge, %4, %5 : vector<128x8xi32>
    %c16_i32_0 = arith.constant 16 : i32
    %7 = vector.broadcast %c16_i32_0 : i32 to vector<128x8xi32>
    %8 = arith.cmpi slt, %4, %7 : vector<128x8xi32>
    %9 = arith.andi %6, %8 : vector<128x8xi1>
    %10 = arith.extui %9 : vector<128x8xi1> to vector<128x8xi32>
    %11 = arith.sitofp %10 : vector<128x8xi32> to vector<128x8xf32>
    %12 = tpu.iota {dimensions = array<i32: 0>} : vector<8x128xi32>
    %13 = tpu.iota {dimensions = array<i32: 1>} : vector<8x128xi32>
    %c16_i32_1 = arith.constant 16 : i32
    %14 = vector.broadcast %c16_i32_1 : i32 to vector<8x128xi32>
    %15 = arith.muli %12, %14 : vector<8x128xi32>
    %16 = arith.subi %13, %15 : vector<8x128xi32>
    %c0_i32_2 = arith.constant 0 : i32
    %17 = vector.broadcast %c0_i32_2 : i32 to vector<8x128xi32>
    %18 = arith.cmpi sge, %16, %17 : vector<8x128xi32>
    %c16_i32_3 = arith.constant 16 : i32
    %19 = vector.broadcast %c16_i32_3 : i32 to vector<8x128xi32>
    %20 = arith.cmpi slt, %16, %19 : vector<8x128xi32>
    %21 = arith.andi %18, %20 : vector<8x128xi1>
    %22 = arith.extui %21 : vector<8x128xi1> to vector<8x128xi32>
    %23 = arith.sitofp %22 : vector<8x128xi32> to vector<8x128xf32>
    %24 = tpu.iota {dimensions = array<i32: 0>} : vector<16x8xi32>
    %25 = tpu.iota {dimensions = array<i32: 1>} : vector<16x8xi32>
    %26 = arith.subi %24, %25 : vector<16x8xi32>
    %c0_i32_4 = arith.constant 0 : i32
    %27 = vector.broadcast %c0_i32_4 : i32 to vector<16x8xi32>
    %28 = arith.cmpi eq, %26, %27 : vector<16x8xi32>
    %c8_i32 = arith.constant 8 : i32
    %29 = vector.broadcast %c8_i32 : i32 to vector<16x8xi32>
    %30 = arith.cmpi eq, %26, %29 : vector<16x8xi32>
    %31 = arith.ori %28, %30 : vector<16x8xi1>
    %32 = arith.extui %31 : vector<16x8xi1> to vector<16x8xi32>
    %33 = arith.sitofp %32 : vector<16x8xi32> to vector<16x8xf32>
    %c0 = arith.constant 0 : index
    %c0_5 = arith.constant 0 : index
    %34 = vector.load %arg2[%c0, %c0_5] : memref<266x8xf32, #tpu.memory_space<vmem>>, vector<256x8xf32>
    %c256 = arith.constant 256 : index
    %c0_6 = arith.constant 0 : index
    %35 = vector.load %arg2[%c256, %c0_6] : memref<266x8xf32, #tpu.memory_space<vmem>>, vector<8x8xf32>
    %c264 = arith.constant 264 : index
    %c0_7 = arith.constant 0 : index
    %36 = vector.load %arg2[%c264, %c0_7] : memref<266x8xf32, #tpu.memory_space<vmem>>, vector<2x8xf32>
    %37 = vector.extract_strided_slice %36 {offsets = [0, 0], sizes = [1, 8], strides = [1, 1]} : vector<2x8xf32> to vector<1x8xf32>
    %38 = vector.extract_strided_slice %36 {offsets = [1, 0], sizes = [1, 8], strides = [1, 1]} : vector<2x8xf32> to vector<1x8xf32>
    %c0_8 = arith.constant 0 : index
    %c0_9 = arith.constant 0 : index
    %39 = vector.load %arg0[%c0_8, %c0_9] : memref<2x256xf32, #tpu.memory_space<vmem>>, vector<2x256xf32>
    %cst = arith.constant dense<0.000000e+00> : vector<2x8xf32>
    %40 = tpu.matmul %39, %34, %cst {dimension_numbers = #tpu.dot_dimension_numbers<[1], [0], [0], [1], [0, 0, 1, 1], [], []>} : vector<2x256xf32>, vector<256x8xf32>, vector<2x8xf32> -> vector<2x8xf32>
    %41 = vector.broadcast %37 : vector<1x8xf32> to vector<2x8xf32>
    %42 = arith.addf %40, %41 : vector<2x8xf32>
    %cst_10 = arith.constant 0.000000e+00 : f32
    %43 = vector.broadcast %cst_10 : f32 to vector<2x8xf32>
    %44 = arith.maximumf %42, %43 : vector<2x8xf32>
    %cst_11 = arith.constant dense<0.000000e+00> : vector<2x8xf32>
    %45 = tpu.matmul %44, %35, %cst_11 {dimension_numbers = #tpu.dot_dimension_numbers<[1], [0], [0], [1], [0, 0, 1, 1], [], []>} : vector<2x8xf32>, vector<8x8xf32>, vector<2x8xf32> -> vector<2x8xf32>
    %46 = vector.broadcast %38 : vector<1x8xf32> to vector<2x8xf32>
    %47 = arith.addf %45, %46 : vector<2x8xf32>
    %48 = math.tanh %47 : vector<2x8xf32>
    %cst_12 = arith.constant 1.000000e+00 : f32
    %49 = vector.broadcast %cst_12 : f32 to vector<2x8xf32>
    %50 = arith.addf %49, %48 : vector<2x8xf32>
    %51 = vector.shape_cast %50 : vector<2x8xf32> to vector<2x1x8xf32>
    %52 = vector.shape_cast %51 : vector<2x1x8xf32> to vector<2x1x8xf32>
    %53 = vector.broadcast %52 : vector<2x1x8xf32> to vector<2x8x8xf32>
    %54 = vector.shape_cast %53 : vector<2x8x8xf32> to vector<16x8xf32>
    %55 = arith.mulf %54, %33 : vector<16x8xf32>
    %cst_13 = arith.constant dense<0.000000e+00> : vector<16xf32>
    %56 = vector.multi_reduction <add>, %55, %cst_13 [1] : vector<16x8xf32> to vector<16xf32>
    %57 = vector.shape_cast %56 : vector<16xf32> to vector<16x1xf32>
    %c0_14 = arith.constant 0 : index
    %c0_15 = arith.constant 0 : index
    %58 = vector.load %arg1[%c0_14, %c0_15] : memref<16x32xf32, #tpu.memory_space<vmem>>, vector<16x32xf32>
    %59 = vector.broadcast %57 : vector<16x1xf32> to vector<16x32xf32>
    %60 = arith.mulf %58, %59 : vector<16x32xf32>
    %c0_16 = arith.constant 0 : index
    %c0_17 = arith.constant 0 : index
    %61 = vector.load %arg4[%c0_16, %c0_17] : memref<8x128xf32, #tpu.memory_space<vmem>>, vector<8x128xf32>
    %62 = vector.shape_cast %61 : vector<8x128xf32> to vector<1x8x128xf32>
    %63 = vector.shape_cast %62 : vector<1x8x128xf32> to vector<1x8x128xf32>
    %64 = vector.broadcast %63 : vector<1x8x128xf32> to vector<2x8x128xf32>
    %65 = vector.shape_cast %64 : vector<2x8x128xf32> to vector<16x128xf32>
    %c0_18 = arith.constant 0 : index
    %c0_19 = arith.constant 0 : index
    %66 = vector.load %arg3[%c0_18, %c0_19] : memref<32x128xf32, #tpu.memory_space<vmem>>, vector<32x128xf32>
    %cst_20 = arith.constant dense<0.000000e+00> : vector<16x128xf32>
    %67 = tpu.matmul %60, %66, %cst_20 {dimension_numbers = #tpu.dot_dimension_numbers<[1], [0], [0], [1], [0, 0, 1, 1], [], []>} : vector<16x32xf32>, vector<32x128xf32>, vector<16x128xf32> -> vector<16x128xf32>
    %68 = arith.addf %67, %65 : vector<16x128xf32>
    %c0_21 = arith.constant 0 : index
    %c0_22 = arith.constant 0 : index
    %69 = vector.load %arg6[%c0_21, %c0_22] : memref<16x128xf32, #tpu.memory_space<vmem>>, vector<16x128xf32>
    tpu.vector_store %arg6[%c0_21, %c0_22], %68 {strides = array<i32>} : memref<16x128xf32, #tpu.memory_space<vmem>>, vector<16x128xf32>,
    %70 = arith.mulf %68, %68 : vector<16x128xf32>
    %cst_23 = arith.constant dense<0.000000e+00> : vector<16x8xf32>
    %71 = tpu.matmul %70, %11, %cst_23 {dimension_numbers = #tpu.dot_dimension_numbers<[1], [0], [0], [1], [0, 0, 1, 1], [], []>} : vector<16x128xf32>, vector<128x8xf32>, vector<16x8xf32> -> vector<16x8xf32>
    %72 = math.sqrt %71 : vector<16x8xf32>
    %cst_24 = arith.constant 5.000000e-01 : f32
    %73 = vector.broadcast %cst_24 : f32 to vector<16x8xf32>
    %74 = arith.addf %73, %71 : vector<16x8xf32>
    %75 = tpu.reciprocal %74 {approx = true} : vector<16x8xf32> -> vector<16x8xf32>
    %76 = arith.mulf %72, %75 : vector<16x8xf32>
    %cst_25 = arith.constant dense<0.000000e+00> : vector<16x128xf32>
    %77 = tpu.matmul %76, %23, %cst_25 {dimension_numbers = #tpu.dot_dimension_numbers<[1], [0], [0], [1], [0, 0, 1, 1], [], []>} : vector<16x8xf32>, vector<8x128xf32>, vector<16x128xf32> -> vector<16x128xf32>
    %78 = arith.mulf %68, %77 : vector<16x128xf32>
    %79 = arith.mulf %71, %76 : vector<16x8xf32>
    %80 = arith.mulf %79, %76 : vector<16x8xf32>
    %cst_26 = arith.constant 0.000000e+00 : f32
    %81 = vector.broadcast %cst_26 : f32 to vector<16x8xf32>
    %cst_27 = arith.constant 0.000000e+00 : f32
    %82 = vector.broadcast %cst_27 : f32 to vector<2x8xf32>
    %c0_i32_28 = arith.constant 0 : i32
    %cst_29 = arith.constant 0.000000e+00 : f32
    %c0_i32_30 = arith.constant 0 : i32
    %83:5 = scf.while (%arg7 = %c0_i32_28, %arg8 = %81, %arg9 = %82, %arg10 = %cst_29, %arg11 = %c0_i32_30) : (i32, vector<16x8xf32>, vector<2x8xf32>, f32, i32) -> (i32, vector<16x8xf32>, vector<2x8xf32>, f32, i32) {
      %c64_i32 = arith.constant 64 : i32
      %92 = arith.cmpi slt, %arg7, %c64_i32 : i32
      %c0_i32_36 = arith.constant 0 : i32
      %93 = arith.cmpi eq, %arg11, %c0_i32_36 : i32
      %94 = arith.andi %92, %93 : i1
      scf.condition(%94) %arg7, %arg8, %arg9, %arg10, %arg11 : i32, vector<16x8xf32>, vector<2x8xf32>, f32, i32
    } do {
    ^bb0(%arg7: i32, %arg8: vector<16x8xf32>, %arg9: vector<2x8xf32>, %arg10: f32, %arg11: i32):
      %cst_36 = arith.constant dense<0xFF800000> : vector<16xf32>
      %92 = vector.multi_reduction <maximumf>, %arg8, %cst_36 [1] : vector<16x8xf32> to vector<16xf32>
      %93 = vector.shape_cast %92 : vector<16xf32> to vector<16x1xf32>
      %cst_37 = arith.constant 0.000000e+00 : f32
      %94 = vector.broadcast %cst_37 : f32 to vector<16x1xf32>
      %95 = arith.maximumf %93, %94 : vector<16x1xf32>
      %96 = vector.broadcast %95 : vector<16x1xf32> to vector<16x8xf32>
      %97 = arith.subf %arg8, %96 : vector<16x8xf32>
      %98 = math.exp %97 : vector<16x8xf32>
      %cst_38 = arith.constant 0.000000e+00 : f32
      %99 = vector.broadcast %cst_38 : f32 to vector<16x1xf32>
      %100 = arith.subf %99, %95 : vector<16x1xf32>
      %101 = math.exp %100 : vector<16x1xf32>
      %cst_39 = arith.constant dense<0.000000e+00> : vector<16xf32>
      %102 = vector.multi_reduction <add>, %98, %cst_39 [1] : vector<16x8xf32> to vector<16xf32>
      %103 = vector.shape_cast %102 : vector<16xf32> to vector<16x1xf32>
      %104 = arith.addf %101, %103 : vector<16x1xf32>
      %105 = tpu.reciprocal %104 {approx = true} : vector<16x1xf32> -> vector<16x1xf32>
      %106 = vector.broadcast %105 : vector<16x1xf32> to vector<16x8xf32>
      %107 = arith.mulf %98, %106 : vector<16x8xf32>
      %cst_40 = arith.constant dense<0.000000e+00> : vector<16x128xf32>
      %108 = tpu.matmul %107, %23, %cst_40 {dimension_numbers = #tpu.dot_dimension_numbers<[1], [0], [0], [1], [0, 0, 1, 1], [], []>} : vector<16x8xf32>, vector<8x128xf32>, vector<16x128xf32> -> vector<16x128xf32>
      %109 = arith.mulf %108, %68 : vector<16x128xf32>
      %110 = vector.shape_cast %109 : vector<16x128xf32> to vector<2x8x128xf32>
      %cst_41 = arith.constant dense<0.000000e+00> : vector<2x128xf32>
      %111 = vector.multi_reduction <add>, %110, %cst_41 [1] : vector<2x8x128xf32> to vector<2x128xf32>
      %112 = arith.mulf %111, %111 : vector<2x128xf32>
      %cst_42 = arith.constant dense<0.000000e+00> : vector<2x8xf32>
      %113 = tpu.matmul %112, %11, %cst_42 {dimension_numbers = #tpu.dot_dimension_numbers<[1], [0], [0], [1], [0, 0, 1, 1], [], []>} : vector<2x128xf32>, vector<128x8xf32>, vector<2x8xf32> -> vector<2x8xf32>
      %114 = math.sqrt %113 : vector<2x8xf32>
      %cst_43 = arith.constant 5.000000e-01 : f32
      %115 = vector.broadcast %cst_43 : f32 to vector<2x8xf32>
      %116 = arith.addf %115, %113 : vector<2x8xf32>
      %117 = tpu.reciprocal %116 {approx = true} : vector<2x8xf32> -> vector<2x8xf32>
      %118 = arith.mulf %114, %117 : vector<2x8xf32>
      %cst_44 = arith.constant dense<0.000000e+00> : vector<2x128xf32>
      %119 = tpu.matmul %118, %23, %cst_44 {dimension_numbers = #tpu.dot_dimension_numbers<[1], [0], [0], [1], [0, 0, 1, 1], [], []>} : vector<2x8xf32>, vector<8x128xf32>, vector<2x128xf32> -> vector<2x128xf32>
      %120 = arith.mulf %111, %119 : vector<2x128xf32>
      %121 = arith.mulf %113, %118 : vector<2x8xf32>
      %122 = arith.mulf %121, %118 : vector<2x8xf32>
      %123 = vector.shape_cast %120 : vector<2x128xf32> to vector<2x1x128xf32>
      %124 = vector.shape_cast %123 : vector<2x1x128xf32> to vector<2x1x128xf32>
      %125 = vector.broadcast %124 : vector<2x1x128xf32> to vector<2x8x128xf32>
      %126 = vector.shape_cast %125 : vector<2x8x128xf32> to vector<16x128xf32>
      %127 = arith.mulf %78, %126 : vector<16x128xf32>
      %cst_45 = arith.constant dense<0.000000e+00> : vector<16x8xf32>
      %128 = tpu.matmul %127, %11, %cst_45 {dimension_numbers = #tpu.dot_dimension_numbers<[1], [0], [0], [1], [0, 0, 1, 1], [], []>} : vector<16x128xf32>, vector<128x8xf32>, vector<16x8xf32> -> vector<16x8xf32>
      %129 = vector.shape_cast %122 : vector<2x8xf32> to vector<2x1x8xf32>
      %130 = vector.shape_cast %129 : vector<2x1x8xf32> to vector<2x1x8xf32>
      %131 = vector.broadcast %130 : vector<2x1x8xf32> to vector<2x8x8xf32>
      %132 = vector.shape_cast %131 : vector<2x8x8xf32> to vector<16x8xf32>
      %133 = arith.addf %80, %132 : vector<16x8xf32>
      %cst_46 = arith.constant 2.000000e+00 : f32
      %134 = vector.broadcast %cst_46 : f32 to vector<16x8xf32>
      %135 = arith.mulf %134, %128 : vector<16x8xf32>
      %136 = arith.subf %133, %135 : vector<16x8xf32>
      %cst_47 = arith.constant 0.000000e+00 : f32
      %137 = vector.broadcast %cst_47 : f32 to vector<16x8xf32>
      %138 = arith.maximumf %136, %137 : vector<16x8xf32>
      %139 = math.sqrt %138 : vector<16x8xf32>
      %cst_48 = arith.constant 1.000000e+00 : f32
      %140 = vector.broadcast %cst_48 : f32 to vector<16x8xf32>
      %141 = arith.subf %140, %139 : vector<16x8xf32>
      %142 = arith.addf %arg8, %141 : vector<16x8xf32>
      %143 = arith.mulf %142, %141 : vector<16x8xf32>
      %144 = vector.shape_cast %143 : vector<16x8xf32> to vector<1x16x8xf32>
      %cst_49 = arith.constant dense<0.000000e+00> : vector<1xf32>
      %145 = vector.multi_reduction <add>, %144, %cst_49 [1, 2] : vector<1x16x8xf32> to vector<1xf32>
      %146 = vector.shape_cast %145 : vector<1xf32> to vector<1x1x1xf32>
      %147 = vector.extract %146[0, 0, 0] : f32 from vector<1x1x1xf32>
      %cst_50 = arith.constant 5.000000e-01 : f32
      %148 = arith.mulf %147, %cst_50 : f32
      %149 = math.log %148 : f32
      %150 = arith.subf %149, %arg10 : f32
      %cst_51 = arith.constant -5.000000e-02 : f32
      %151 = arith.cmpf ogt, %150, %cst_51 : f32
      %cst_52 = arith.constant 5.000000e-02 : f32
      %152 = arith.cmpf olt, %150, %cst_52 : f32
      %153 = arith.andi %151, %152 : i1
      %cst_53 = arith.constant dense<0xFF800000> : vector<16xf32>
      %154 = vector.multi_reduction <maximumf>, %142, %cst_53 [1] : vector<16x8xf32> to vector<16xf32>
      %155 = vector.shape_cast %154 : vector<16xf32> to vector<16x1xf32>
      %cst_54 = arith.constant 0.000000e+00 : f32
      %156 = vector.broadcast %cst_54 : f32 to vector<16x1xf32>
      %157 = arith.maximumf %155, %156 : vector<16x1xf32>
      %158 = vector.broadcast %157 : vector<16x1xf32> to vector<16x8xf32>
      %159 = arith.subf %142, %158 : vector<16x8xf32>
      %160 = math.exp %159 : vector<16x8xf32>
      %cst_55 = arith.constant 0.000000e+00 : f32
      %161 = vector.broadcast %cst_55 : f32 to vector<16x1xf32>
      %162 = arith.subf %161, %157 : vector<16x1xf32>
      %163 = math.exp %162 : vector<16x1xf32>
      %cst_56 = arith.constant dense<0.000000e+00> : vector<16xf32>
      %164 = vector.multi_reduction <add>, %160, %cst_56 [1] : vector<16x8xf32> to vector<16xf32>
      %165 = vector.shape_cast %164 : vector<16xf32> to vector<16x1xf32>
      %166 = arith.addf %163, %165 : vector<16x1xf32>
      %167 = tpu.reciprocal %166 {approx = true} : vector<16x1xf32> -> vector<16x1xf32>
      %168 = vector.broadcast %167 : vector<16x1xf32> to vector<16x8xf32>
      %169 = arith.mulf %160, %168 : vector<16x8xf32>
      %cst_57 = arith.constant dense<0.000000e+00> : vector<16x128xf32>
      %170 = tpu.matmul %169, %23, %cst_57 {dimension_numbers = #tpu.dot_dimension_numbers<[1], [0], [0], [1], [0, 0, 1, 1], [], []>} : vector<16x8xf32>, vector<8x128xf32>, vector<16x128xf32> -> vector<16x128xf32>
      %171 = arith.mulf %170, %68 : vector<16x128xf32>
      %172 = vector.shape_cast %171 : vector<16x128xf32> to vector<2x8x128xf32>
      %cst_58 = arith.constant dense<0.000000e+00> : vector<2x128xf32>
      %173 = vector.multi_reduction <add>, %172, %cst_58 [1] : vector<2x8x128xf32> to vector<2x128xf32>
      %174 = arith.mulf %173, %173 : vector<2x128xf32>
      %cst_59 = arith.constant dense<0.000000e+00> : vector<2x8xf32>
      %175 = tpu.matmul %174, %11, %cst_59 {dimension_numbers = #tpu.dot_dimension_numbers<[1], [0], [0], [1], [0, 0, 1, 1], [], []>} : vector<2x128xf32>, vector<128x8xf32>, vector<2x8xf32> -> vector<2x8xf32>
      %176 = math.sqrt %175 : vector<2x8xf32>
      %cst_60 = arith.constant 5.000000e-01 : f32
      %177 = vector.broadcast %cst_60 : f32 to vector<2x8xf32>
      %178 = arith.addf %177, %175 : vector<2x8xf32>
      %179 = tpu.reciprocal %178 {approx = true} : vector<2x8xf32> -> vector<2x8xf32>
      %180 = arith.mulf %176, %179 : vector<2x8xf32>
      %cst_61 = arith.constant dense<0.000000e+00> : vector<2x128xf32>
      %181 = tpu.matmul %180, %23, %cst_61 {dimension_numbers = #tpu.dot_dimension_numbers<[1], [0], [0], [1], [0, 0, 1, 1], [], []>} : vector<2x8xf32>, vector<8x128xf32>, vector<2x128xf32> -> vector<2x128xf32>
      %182 = arith.mulf %173, %181 : vector<2x128xf32>
      %183 = arith.mulf %175, %180 : vector<2x8xf32>
      %184 = arith.mulf %183, %180 : vector<2x8xf32>
      %185 = vector.shape_cast %182 : vector<2x128xf32> to vector<2x1x128xf32>
      %186 = vector.shape_cast %185 : vector<2x1x128xf32> to vector<2x1x128xf32>
      %187 = vector.broadcast %186 : vector<2x1x128xf32> to vector<2x8x128xf32>
      %188 = vector.shape_cast %187 : vector<2x8x128xf32> to vector<16x128xf32>
      %189 = arith.mulf %78, %188 : vector<16x128xf32>
      %cst_62 = arith.constant dense<0.000000e+00> : vector<16x8xf32>
      %190 = tpu.matmul %189, %11, %cst_62 {dimension_numbers = #tpu.dot_dimension_numbers<[1], [0], [0], [1], [0, 0, 1, 1], [], []>} : vector<16x128xf32>, vector<128x8xf32>, vector<16x8xf32> -> vector<16x8xf32>
      %191 = vector.shape_cast %184 : vector<2x8xf32> to vector<2x1x8xf32>
      %192 = vector.shape_cast %191 : vector<2x1x8xf32> to vector<2x1x8xf32>
      %193 = vector.broadcast %192 : vector<2x1x8xf32> to vector<2x8x8xf32>
      %194 = vector.shape_cast %193 : vector<2x8x8xf32> to vector<16x8xf32>
      %195 = arith.addf %80, %194 : vector<16x8xf32>
      %cst_63 = arith.constant 2.000000e+00 : f32
      %196 = vector.broadcast %cst_63 : f32 to vector<16x8xf32>
      %197 = arith.mulf %196, %190 : vector<16x8xf32>
      %198 = arith.subf %195, %197 : vector<16x8xf32>
      %cst_64 = arith.constant 0.000000e+00 : f32
      %199 = vector.broadcast %cst_64 : f32 to vector<16x8xf32>
      %200 = arith.maximumf %198, %199 : vector<16x8xf32>
      %201 = math.sqrt %200 : vector<16x8xf32>
      %cst_65 = arith.constant 1.000000e+00 : f32
      %202 = vector.broadcast %cst_65 : f32 to vector<16x8xf32>
      %203 = arith.subf %202, %201 : vector<16x8xf32>
      %204 = arith.addf %142, %203 : vector<16x8xf32>
      %205 = arith.mulf %204, %203 : vector<16x8xf32>
      %206 = vector.shape_cast %205 : vector<16x8xf32> to vector<1x16x8xf32>
      %cst_66 = arith.constant dense<0.000000e+00> : vector<1xf32>
      %207 = vector.multi_reduction <add>, %206, %cst_66 [1, 2] : vector<1x16x8xf32> to vector<1xf32>
      %208 = vector.shape_cast %207 : vector<1xf32> to vector<1x1x1xf32>
      %209 = vector.extract %208[0, 0, 0] : f32 from vector<1x1x1xf32>
      %cst_67 = arith.constant 5.000000e-01 : f32
      %210 = arith.mulf %209, %cst_67 : f32
      %211 = math.log %210 : f32
      %212 = arith.subf %211, %149 : f32
      %cst_68 = arith.constant -5.000000e-02 : f32
      %213 = arith.cmpf ogt, %212, %cst_68 : f32
      %cst_69 = arith.constant 5.000000e-02 : f32
      %214 = arith.cmpf olt, %212, %cst_69 : f32
      %215 = arith.andi %213, %214 : i1
      %216 = arith.select %153, %142, %204 : vector<16x8xf32>
      %217 = arith.select %153, %113, %175 : vector<2x8xf32>
      %218 = arith.select %153, %149, %211 : f32
      %219 = arith.ori %153, %215 : i1
      %c2_i32 = arith.constant 2 : i32
      %220 = arith.addi %arg7, %c2_i32 : i32
      %221 = arith.extui %219 : i1 to i32
      scf.yield %220, %216, %217, %218, %221 : i32, vector<16x8xf32>, vector<2x8xf32>, f32, i32
    }
    %cst_31 = arith.constant 5.000000e-01 : f32
    %84 = vector.broadcast %cst_31 : f32 to vector<2x8xf32>
    %85 = arith.addf %84, %83#2 : vector<2x8xf32>
    %86 = arith.divf %83#2, %85 : vector<2x8xf32>
    %cst_32 = arith.constant 9.99999997E-7 : f32
    %cst_33 = arith.constant 0.999998986 : f32
    %87 = vector.broadcast %cst_32 : f32 to vector<2x8xf32>
    %88 = arith.maximumf %87, %86 : vector<2x8xf32>
    %89 = vector.broadcast %cst_33 : f32 to vector<2x8xf32>
    %90 = arith.minimumf %89, %88 : vector<2x8xf32>
    %c0_34 = arith.constant 0 : index
    %c0_35 = arith.constant 0 : index
    %91 = vector.load %arg5[%c0_34, %c0_35] : memref<2x8xf32, #tpu.memory_space<vmem>>, vector<2x8xf32>
    tpu.vector_store %arg5[%c0_34, %c0_35], %90 {strides = array<i32>} : memref<2x8xf32, #tpu.memory_space<vmem>>, vector<2x8xf32>,
    return
  }
}

</mosaic_0001>

<bundles_post_ra>
// kernel: kde_capsule_forward.1
= control target key start
LH: loop header
LB: loop body
LE: loop exit
PB: predicated region body
PF: predicated region fallthrough
CT: control target
= control target key end

     0   :  { %12 = vsyncpa [#allocation3], 0  ;;  %v2495_v50 = vmov 0.0   ;;  %vm2496_vm0 = vmmov 0   ;;  %v23_v52 = vlaneseq  ;;  %vm3187_vm1 = vcmask 64512   ;;  %s3180_s0 = inlined_call_operand.vmem [shape: f32[2,256], index: 0, kind: input, shape index: {}]   ;;  %s3181_s1 = inlined_call_operand.vmem [shape: f32[16,32], index: 1, kind: input, shape index: {}]   ;;  %s3182_s2 = inlined_call_operand.vmem [shape: f32[266,8], index: 2, kind: input, shape index: {}]   ;;  %s3183_s3 = inlined_call_operand.vmem [shape: f32[32,128], index: 3, kind: input, shape index: {}]   ;;  %s3184_s4 = inlined_call_operand.vmem [shape: f32[8,128], index: 4, kind: input, shape index: {}]   ;;  %s3185_s5 = inlined_call_operand.hbm [shape: f32[2,8], index: 5, kind: output, shape index: {0}]   ;;  %s3186_s6 = inlined_call_operand.vmem [shape: f32[16,128], index: 6, kind: output, shape index: {1}]  }
   0x1   :  { %v174_v0 = vld [vmem:[%s3182_s2 + $0x80] sm:$0xff]  ;;  %v175_v1 = vld [vmem:[%s3182_s2 + $0x88] sm:$0xff]  ;;  %v176_v5 = vld [vmem:[%s3182_s2 + $0x90] sm:$0xff] }
   0x2   :  { %v2148_v2 = vpack.c.bf16 %v175_v1, %v174_v0  ;;  %v158_v3 = vld [vmem:[%s3182_s2] sm:$0xff]  ;;  %v159_v4 = vld [vmem:[%s3182_s2 + $0x8] sm:$0xff]  ;;  %v177_v7 = vld [vmem:[%s3182_s2 + $0x98] sm:$0xff]  ;;  %v2643_v53 = vshrl.u32 %v23_v52, 7 }
   0x3   :  { %v2150_v6 = vpack.c.bf16 %v159_v4, %v158_v3  ;;  %v160_v8 = vld [vmem:[%s3182_s2 + $0x10] sm:$0xff]  ;;  %v161_v9 = vld [vmem:[%s3182_s2 + $0x18] sm:$0xff]  ;;  %v2152_v10 = vpack.c.bf16 %v177_v7, %v176_v5  ;;  %v178_v11 = vld [vmem:[%s3182_s2 + $0xa0] sm:$0xff] }
   0x4   :  { %2149 = vmatprep.subr.bf16.mxu0 %v2148_v2  ;;  %v179_v12 = vld [vmem:[%s3182_s2 + $0xa8] sm:$0xff]  ;;  %v2154_v13 = vpack.c.bf16 %v161_v9, %v160_v8  ;;  %v162_v15 = vld [vmem:[%s3182_s2 + $0x20] sm:$0xff]  ;;  %v180_v17 = vld [vmem:[%s3182_s2 + $0xb0] sm:$0xff]  ;;  %v2646_v54 = vsub.s32 0, %v2643_v53  ;;  %v281_v1 = vsub.s32 1, %v2643_v53  ;;  %v2660_v8 = vand.u32 127, %v23_v52 }
   0x5   :  { %2151 = vmatpush3.bf16.msra.mxu0 %v2150_v6  ;;  %v2156_v14 = vpack.c.bf16 %v179_v12, %v178_v11  ;;  %v163_v16 = vld [vmem:[%s3182_s2 + $0x28] sm:$0xff]  ;;  %v181_v18 = vld [vmem:[%s3182_s2 + $0xb8] sm:$0xff]  ;;  %v164_v21 = vld [vmem:[%s3182_s2 + $0x30] sm:$0xff]  ;;  %v2497_v6 = vmov 1966171168   ;;  %v25_v9 = vadd.s32 8, %v2643_v53 }
   0x6   :  { %2153 = vmatprep.subr.bf16.mxu0 %v2152_v10  ;;  %v2158_v19 = vpack.c.bf16 %v163_v16, %v162_v15  ;;  %v2160_v20 = vpack.c.bf16 %v181_v18, %v180_v17  ;;  %v165_v22 = vld [vmem:[%s3182_s2 + $0x38] sm:$0xff]  ;;  %v182_v23 = vld [vmem:[%s3182_s2 + $0xc0] sm:$0xff]  ;;  %v183_v24 = vld [vmem:[%s3182_s2 + $0xc8] sm:$0xff]  ;;  %v361_v7 = vunpack.c.l.s4 %v2497_v6 }
   0x7   :  { %v1689_v25 = vld.sshfl [vmem:[%s3180_s0] sm:$0x33 pattern:$0x76325410]  ;;  %v2162_v26 = vpack.c.bf16 %v165_v22, %v164_v21  ;;  %v2164_v28 = vpack.c.bf16 %v183_v24, %v182_v23  ;;  %v167_v30 = vld [vmem:[%s3182_s2 + $0x48] sm:$0xff]  ;;  %v184_v31 = vld [vmem:[%s3182_s2 + $0xd0] sm:$0xff]  ;;  %v147_v11 = vsub.s32 %v25_v9, %v2660_v8 }
   0x8   :  { %v205_v27 = vcombine.high %v1689_v25, %v1689_v25  ;;  %v166_v29 = vld [vmem:[%s3182_s2 + $0x40] sm:$0xff]  ;;  %v185_v32 = vld [vmem:[%s3182_s2 + $0xd8] sm:$0xff]  ;;  %v168_v35 = vld [vmem:[%s3182_s2 + $0x50] sm:$0xff]  ;;  %v362_v10 = vunpack.c.0.s8 %v361_v7 }
   0x9   :  { %2155 = vmatpush3.bf16.msra.mxu0 %v2154_v13  ;;  %v2166_v33 = vpack.c.bf16 %v167_v30, %v166_v29  ;;  %v2168_v34 = vpack.c.bf16 %v185_v32, %v184_v31  ;;  %v169_v36 = vld [vmem:[%s3182_s2 + $0x58] sm:$0xff]  ;;  %v186_v37 = vld [vmem:[%s3182_s2 + $0xe0] sm:$0xff]  ;;  %v187_v38 = vld [vmem:[%s3182_s2 + $0xe8] sm:$0xff]  ;;  %v146_v13 = vsub.s32 %v2643_v53, %v2660_v8  ;;  %vm149_vm2 = vcmp.eq.s32.totalorder %v147_v11, 0 }
   0xa   :  { %2157 = vmatprep.subr.bf16.mxu0 %v2156_v14  ;;  %272 = vmatprep.mubr.f32.mxu0 %v205_v27  ;;  %v2170_v39 = vpack.c.bf16 %v169_v36, %v168_v35  ;;  %v2172_v40 = vpack.c.bf16 %v187_v38, %v186_v37  ;;  %v170_v41 = vld [vmem:[%s3182_s2 + $0x60] sm:$0xff]  ;;  %v171_v42 = vld [vmem:[%s3182_s2 + $0x68] sm:$0xff]  ;;  %v188_v43 = vld [vmem:[%s3182_s2 + $0xf0] sm:$0xff]  ;;  %v2665_v12 = vsub.s32 %v362_v10, %v2643_v53  ;;  %vm151_vm3 = vcmp.eq.s32.totalorder %v147_v11, 8 }
   0xb   :  { %v189_v44 = vld [vmem:[%s3182_s2 + $0xf8] sm:$0xff]  ;;  %v2174_v45 = vpack.c.bf16 %v171_v42, %v170_v41  ;;  %v172_v47 = vld [vmem:[%s3182_s2 + $0x70] sm:$0xff]  ;;  %v190_v51 = vld [vmem:[%s3182_s2 + $0x100] sm:$0xff]  ;;  %vm148_vm4 = vcmp.eq.s32.totalorder %v146_v13, 0  ;;  %v2683_v31 = vmul.u32 16, %v2660_v8  ;;  %v26_v36 = vadd.s32 16, %v2643_v53 }
   0xc   :  { %v2176_v46 = vpack.c.bf16 %v189_v44, %v188_v43  ;;  %v173_v48 = vld [vmem:[%s3182_s2 + $0x78] sm:$0xff]  ;;  %v191_v55 = vld [vmem:[%s3182_s2 + $0x108] sm:$0x3]  ;;  %v405_v62 = vld [vmem:[%s3183_s3] sm:$0xff]  ;;  %v2498_v35 = vmov 1.0|1.0  }
   0xd   :  { %2159 = vmatpush3.bf16.msra.mxu0 %v2158_v19  ;;  %v2178_v49 = vpack.c.bf16 %v173_v48, %v172_v47  ;;  %v196_v57 = vrot.slane %v191_v55, %v2646_v54  ;;  %v406_v63 = vld [vmem:[%s3183_s3 + $0x8] sm:$0xff]  ;;  %v282_v2 = vrot.slane %v191_v55, %v281_v1  ;;  %vm153_vm5 = vmor %vm149_vm2, %vm151_vm3  ;;  %v1687_v19 = vsel %vm148_vm4, 1.0, %v2495_v50  ;;  %v408_v29 = vld [vmem:[%s3183_s3 + $0x18] sm:$0xff] }
   0xe   :  { %2161 = vmatprep.subr.bf16.mxu0 %v2160_v20  ;;  %v2180_v0 = vpack.c.bf16 %v406_v63, %v405_v62  ;;  %v1688_v22 = vsel %vm153_vm5, 1.0, %v2495_v50  ;;  %v43_v32 = vsub.s32 %v2643_v53, %v2683_v31  ;;  %v27_v37 = vadd.s32 24, %v2643_v53  ;;  %v400_v42 = vld [vmem:[%s3181_s1] sm:$0xff] }
   0xf   :  { %v45_v38 = vsub.s32 %v26_v36, %v2683_v31  ;;  %v29_v41 = vadd.s32 40, %v2643_v53  ;;  %vm409_vm2 = vcmask 261120   ;;  %v31_v47 = vadd.s32 56, %v2643_v53 }
  0x10   :  { %2181 = vmatprep.subr.bf16.mxu1 %v2180_v0  ;;  %vm59_vm6 = vcmp.ge.s32.totalorder %v43_v32, 0  ;;  %vm75_vm8 = vcmp.lt.s32.totalorder %v43_v32, 16  ;;  %v35_v62 = vadd.s32 88, %v2643_v53  ;;  %v3196_v63 = vmov 0 }
  0x11   :  { %2163 = vmatpush3.bf16.msra.mxu0 %v2162_v26  ;;  %2183 = vmatpush3.bf16.msra.mxu1 %v2180_v0  ;;  %vm91_vm10 = vmand %vm59_vm6, %vm75_vm8  ;;  %vm61_vm13 = vcmp.ge.s32.totalorder %v45_v38, 0  ;;  %vm77_vm14 = vcmp.lt.s32.totalorder %v45_v38, 16  ;;  %v48_v44 = vsub.s32 %v29_v41, %v2683_v31  ;;  %v38_v11 = vadd.s32 112, %v2643_v53 }
  0x12   :  { %2165 = vmatprep.subr.bf16.mxu0 %v2164_v28  ;;  %v407_v28 = vld [vmem:[%s3183_s3 + $0x10] sm:$0xff]  ;;  %vm93_vm3 = vmand %vm61_vm13, %vm77_vm14  ;;  %v54_v1 = vsub.s32 %v35_v62, %v2683_v31  ;;  %v39_v13 = vadd.s32 120, %v2643_v53 }
  0x13   :  { %v2184_v30 = vpack.c.bf16 %v408_v29, %v407_v28  ;;  %vm80_vm8 = vcmp.lt.s32.totalorder %v48_v44, 16 }
  0x15   :  { %2167 = vmatpush3.bf16.msra.mxu0 %v2166_v33  ;;  %2185 = vmatprep.subr.bf16.mxu1 %v2184_v30  ;;  %v44_v33 = vsub.s32 %v25_v9, %v2683_v31 }
  0x16   :  { %2169 = vmatprep.subr.bf16.mxu0 %v2168_v34  ;;  %2187 = vmatpush3.bf16.msra.mxu1 %v2184_v30 }
  0x17   :  { %vm60_vm7 = vcmp.ge.s32.totalorder %v44_v33, 0  ;;  %vm76_vm9 = vcmp.lt.s32.totalorder %v44_v33, 16 }
  0x18   :  { %vm92_vm11 = vmand %vm60_vm7, %vm76_vm9  ;;  %vm64_vm7 = vcmp.ge.s32.totalorder %v48_v44, 0 }
  0x19   :  { %2171 = vmatpush3.bf16.msra.mxu0 %v2170_v39  ;;  %vm2688_vm12 = vmpackc.low %vm92_vm11, %vm91_vm10  ;;  %v46_v39 = vsub.s32 %v27_v37, %v2683_v31 }
  0x1a   :  { %2173 = vmatprep.subr.bf16.mxu0 %v2172_v40  ;;  %2189 = vmatprep.subr.msk.bf16.mxu1 %vm2688_vm12, %v2498_v35  ;;  %v28_v40 = vadd.s32 32, %v2643_v53  ;;  %vm96_vm11 = vmand %vm64_vm7, %vm80_vm8 }
  0x1b   :  { %vm62_vm15 = vcmp.ge.s32.totalorder %v46_v39, 0 }
  0x1c   :  { %v47_v43 = vsub.s32 %v28_v40, %v2683_v31 }
  0x1d   :  { %2175 = vmatpush3.bf16.msra.mxu0 %v2174_v45  ;;  %v30_v45 = vadd.s32 48, %v2643_v53 }
  0x1e   :  { %2177 = vmatprep.subr.bf16.mxu0 %v2176_v46  ;;  %vm63_vm5 = vcmp.ge.s32.totalorder %v47_v43, 0  ;;  %vm79_vm6 = vcmp.lt.s32.totalorder %v47_v43, 16 }
  0x1f   :  { %v49_v52 = vsub.s32 %v30_v45, %v2683_v31  ;;  %vm95_vm10 = vmand %vm63_vm5, %vm79_vm6 }
  0x21   :  { %2179 = vmatpush3.bf16.msra.mxu0 %v2178_v49  ;;  %v32_v49 = vadd.s32 64, %v2643_v53  ;;  %vm65_vm13 = vcmp.ge.s32.totalorder %v49_v52, 0  ;;  %vm81_vm14 = vcmp.lt.s32.totalorder %v49_v52, 16 }
  0x22   :  { %1932 = vmatprep.subr.mxu0 %v2495_v50  ;;  %vm97_vm5 = vmand %vm65_vm13, %vm81_vm14 }
  0x24   :  { %273 = vmatmul.mubr.f32.vlgmr.msra.gmra.mrb[0].mxu0 %v1689_v25 }
  0x25   :  { %1933 = vmatpush3.msra.mxu0 %v190_v51  ;;  %1934 = vmatprep.mubr.msk.f32.mxu0 %vm2496_vm0, %v2495_v50  ;;  %vm78_vm0 = vcmp.lt.s32.totalorder %v46_v39, 16  ;;  %v401_v50 = vld [vmem:[%s3181_s1 + $0x8] sm:$0xff]  ;;  %v33_v51 = vadd.s32 72, %v2643_v53 }
  0x26   :  { %vm94_vm4 = vmand %vm62_vm15, %vm78_vm0 }
  0x27   :  { %vm2715_vm9 = vmpackc.low %vm94_vm4, %vm93_vm3 }
  0x28   :  { %vm2731_vm3 = vmpackc.low %vm96_vm11, %vm95_vm10 }
  0x29   :  { %v3197_v63 = vsel %vm2731_vm3, 4294967295, %v3196_v63 }
  0xf7   :  { %v1820_v56 = vpop.f32.mrb[0].mxu0 }
  0xf8   :  { %v1821_v58 = vpop.f32.mrb[1].mxu0 }
  0xf9   :  { %v1822_v59 = vadd.f32 %v1821_v58, %v1820_v56  ;;  %v3194_v56 = vmov 0 }
  0xfa   :  { %v3195_v56 = vsel %vm2715_vm9, 4294967295, %v3194_v56 }
  0xfb   :  { %v275_v60 = vadd.f32 %v1822_v59, %v196_v57  ;;  %v50_v57 = vsub.s32 %v31_v47, %v2683_v31  ;;  %v51_v59 = vsub.s32 %v32_v49, %v2683_v31 }
  0xfd   :  { %v278_v61 = vmax.f32 %v275_v60, 0.0  ;;  %v52_v60 = vsub.s32 %v33_v51, %v2683_v31  ;;  %vm66_vm15 = vcmp.ge.s32.totalorder %v50_v57, 0  ;;  %vm82_vm0 = vcmp.lt.s32.totalorder %v50_v57, 16 }
  0xfe   :  { %vm67_vm4 = vcmp.ge.s32.totalorder %v51_v59, 0  ;;  %vm98_vm8 = vmand %vm66_vm15, %vm82_vm0  ;;  %vm70_vm0 = vcmp.ge.s32.totalorder %v54_v1, 0  ;;  %v2849_v57 = vmov 0.0  }
  0xff   :  { %1935 = vmatmul.mubr.msk.f32.vlgmr.msra.gmra.mrb[2].mxu0 %vm3187_vm1, %v278_v61  ;;  %v34_v61 = vadd.s32 80, %v2643_v53  ;;  %vm68_vm6 = vcmp.ge.s32.totalorder %v52_v60, 0  ;;  %vm84_vm7 = vcmp.lt.s32.totalorder %v52_v60, 16  ;;  %vm2745_vm13 = vmpackc.low %vm98_vm8, %vm97_vm5 }
 0x100   :  { %vm100_vm11 = vmand %vm68_vm6, %vm84_vm7 }
 0x101   :  { %v53_v0 = vsub.s32 %v34_v61, %v2683_v31 }
 0x103   :  { %vm69_vm14 = vcmp.ge.s32.totalorder %v53_v0, 0  ;;  %vm85_vm15 = vcmp.lt.s32.totalorder %v53_v0, 16 }
 0x1d2   :  { %v353_v3 = vpop.f32.mrb[2].mxu0 }
 0x1d3   :  { %v354_v4 = vadd.f32 %v353_v3, %v282_v2  ;;  %v1936_v5 = vpop.f32.mrb[3].mxu0  ;;  %v36_v2 = vadd.s32 96, %v2643_v53  ;;  %v37_v3 = vadd.s32 104, %v2643_v53 }
 0x1d5   :  { %2383 = vtanh.f32 %v354_v4  ;;  %v55_v5 = vsub.s32 %v36_v2, %v2683_v31  ;;  %v56_v7 = vsub.s32 %v37_v3, %v2683_v31 }
 0x1d7   :  { %vm71_vm6 = vcmp.ge.s32.totalorder %v55_v5, 0  ;;  %vm87_vm7 = vcmp.lt.s32.totalorder %v55_v5, 16  ;;  %vm72_vm8 = vcmp.ge.s32.totalorder %v56_v7, 0 }
 0x1df   :  { %v2384_v14 = vpop.eup %2383 }
 0x1e0   :  { %v358_v15 = vadd.f32 1.0, %v2384_v14  ;;  %v57_v14 = vsub.s32 %v38_v11, %v2683_v31 }
 0x1e2   :  { %v366_v16 = vrot.slane %v358_v15, %v2665_v12  ;;  %v58_v15 = vsub.s32 %v39_v13, %v2683_v31 }
 0x1e4   :  { %v367_v17 = vcombine.high %v366_v16, %v366_v16  ;;  %v374_v18 = vrot.slane %v366_v16, %v2665_v12 }
 0x1e6   :  { %v385_v20 = vrot.slane %v374_v18, %v2646_v54  ;;  %v381_v21 = vrot.slane %v367_v17, %v2665_v12  ;;  %v404_v17 = vld [vmem:[%s3184_s4] sm:$0xff]  ;;  %s2845_s4 = smov 0.0  }
 0x1e8   :  { %v392_v23 = vmul.f32 %v1687_v19, %v385_v20  ;;  %v389_v24 = vrot.slane %v381_v21, %v2646_v54 }
 0x1ea   :  { %v394_v25 = vsel %vm3187_vm1, %v392_v23, 0.0  ;;  %v393_v26 = vmul.f32 %v1688_v22, %v389_v24  ;;  %v139_v24 = vmul.u32 16, %v2643_v53 }
 0x1eb   :  { %395 = vadd.xlane.f32.xlu0 %v394_v25 }
 0x1ec   :  { %v397_v27 = vsel %vm3187_vm1, %v393_v26, 0.0  ;;  %vm86_vm1 = vcmp.lt.s32.totalorder %v54_v1, 16  ;;  %v140_v25 = vsub.s32 %v2660_v8, %v139_v24 }
 0x1ed   :  { %vm102_vm5 = vmand %vm70_vm0, %vm86_vm1 }
 0x1ef   :  { %398 = vadd.xlane.f32.xlu0 %v397_v27  ;;  %v2499_v27 = vmov 1.0  }
 0x278   :  { %v396_v46 = vpop.xlane.xlu0 %395 }
 0x279   :  { %v402_v48 = vmul.f32 %v400_v42, %v396_v46 }
 0x27b   :  { %1945 = vmatprep.mubr.msk.f32.mxu1 %vm409_vm2, %v402_v48 }
 0x27c   :  { %v399_v55 = vpop.xlane.xlu0 %398 }
 0x27d   :  { %v403_v58 = vmul.f32 %v401_v50, %v399_v55  ;;  %v2847_v55 = vmov 0.0  }
 0x27f   :  { %1946 = vmatmul.mubr.msk.f32.vlgmr.msra.gmra.mrb[0].mxu1 %vm409_vm2, %v403_v58  ;;  %vm83_vm2 = vcmp.lt.s32.totalorder %v51_v59, 16 }
 0x280   :  { %2191 = vmatpush3.bf16.msk.msra.mxu1 %vm2688_vm12, %v2498_v35  ;;  %vm99_vm10 = vmand %vm67_vm4, %vm83_vm2 }
 0x281   :  { %2193 = vmatprep.subr.msk.bf16.mxu1 %vm2715_vm9, %v2498_v35  ;;  %vm2753_vm4 = vmpackc.low %vm100_vm11, %vm99_vm10 }
 0x282   :  { %vm101_vm2 = vmand %vm69_vm14, %vm85_vm15  ;;  %vm89_vm14 = vcmp.lt.s32.totalorder %v57_v14, 16  ;;  %vm90_vm15 = vcmp.lt.s32.totalorder %v58_v15, 16 }
 0x283   :  { %vm2767_vm10 = vmpackc.low %vm102_vm5, %vm101_vm2 }
 0x284   :  { %2195 = vmatpush3.bf16.msk.msra.mxu1 %vm2715_vm9, %v2498_v35  ;;  %vm103_vm11 = vmand %vm71_vm6, %vm87_vm7  ;;  %vm141_vm6 = vcmp.ge.s32.totalorder %v140_v25, 0  ;;  %vm142_vm7 = vcmp.lt.s32.totalorder %v140_v25, 16 }
 0x285   :  { %2197 = vmatprep.subr.msk.bf16.mxu1 %vm2731_vm3, %v2498_v35 }
 0x288   :  { %2199 = vmatpush3.bf16.msk.msra.mxu1 %vm2731_vm3, %v2498_v35  ;;  %vm88_vm3 = vcmp.lt.s32.totalorder %v56_v7, 16 }
 0x289   :  { %2201 = vmatprep.subr.msk.bf16.mxu1 %vm2745_vm13, %v2498_v35  ;;  %vm104_vm9 = vmand %vm72_vm8, %vm88_vm3  ;;  %vm74_vm3 = vcmp.ge.s32.totalorder %v58_v15, 0 }
 0x28a   :  { %vm2777_vm1 = vmpackc.low %vm104_vm9, %vm103_vm11  ;;  %vm73_vm9 = vcmp.ge.s32.totalorder %v57_v14, 0 }
 0x28b   :  { %vm105_vm0 = vmand %vm73_vm9, %vm89_vm14 }
 0x28c   :  { %2203 = vmatpush3.bf16.msk.msra.mxu1 %vm2745_vm13, %v2498_v35  ;;  %vm106_vm2 = vmand %vm74_vm3, %vm90_vm15  ;;  %vm3210_vm15 = vcmask 64512  }
 0x28d   :  { %2205 = vmatprep.subr.msk.bf16.mxu1 %vm2753_vm4, %v2498_v35  ;;  %vm2794_vm5 = vmpackc.low %vm106_vm2, %vm105_vm0 }
 0x28e   :  { %vm2825_vm8 = vmand %vm141_vm6, %vm142_vm7 }
 0x28f   :  { %1983 = vmatprep.subr.msk.mxu0 %vm2825_vm8, %v2499_v27  ;;  %vm3211_vm0 = vmmov %vm3210_vm15 }
 0x290   :  { %2207 = vmatpush3.bf16.msk.msra.mxu1 %vm2753_vm4, %v2498_v35  ;;  %1984 = vmatpush3.msk.msra.mxu0 %vm2825_vm8, %v2499_v27 }
 0x291   :  { %2209 = vmatprep.subr.msk.bf16.mxu1 %vm2767_vm10, %v2498_v35 }
 0x294   :  { %2211 = vmatpush3.bf16.msk.msra.mxu1 %vm2767_vm10, %v2498_v35 }
 0x295   :  { %2213 = vmatprep.subr.msk.bf16.mxu1 %vm2777_vm1, %v2498_v35 }
 0x298   :  { %2215 = vmatpush3.bf16.msk.msra.mxu1 %vm2777_vm1, %v2498_v35 }
 0x299   :  { %2217 = vmatprep.subr.msk.bf16.mxu1 %vm2794_vm5, %v2498_v35 }
 0x29c   :  { %2219 = vmatpush3.bf16.msk.msra.mxu1 %vm2794_vm5, %v2498_v35 }
 0x352   :  { %v1947_v18 = vpop.f32.mrb[0].mxu1 }
 0x353   :  { %v2807_v19 = vadd.f32 %v1947_v18, %v404_v17  ;;  %v482_v20 = vpop.f32.mrb[1].mxu1 }
 0x354   :  { %v2809_v21 = vadd.f32 %v482_v20, %v404_v17 }
 0x355   :  { %492 = vst [vmem:[%s3186_s6 + $0x8] sm:$0xff] %v2807_v19  ;;  %v494_v23 = vmul.f32 %v2807_v19, %v2807_v19 }
 0x356   :  { %491 = vst [vmem:[%s3186_s6] sm:$0xff] %v2809_v21  ;;  %v493_v22 = vmul.f32 %v2809_v21, %v2809_v21  ;;  %s2851_s6 = smov 0  }
 0x358   :  { %1980 = vmatprep.mubr.f32.mxu1 %v493_v22 }
 0x359   :  { %1981 = vmatmul.mubr.f32.vlgmr.msra.gmra.mrb[2].mxu1 %v494_v23 }
 0x42c   :  { %v1982_v28 = vpop.f32.mrb[2].mxu1 }
 0x42d   :  { %2385 = vrsqrt.f32 %v1982_v28  ;;  %v585_v29 = vadd.f32 0.5, %v1982_v28  ;;  %v561_v30 = vpop.f32.mrb[3].mxu1  ;;  %vm579_vm11 = vcmp.eq.f32.partialorder %v1982_v28, inf  ;;  %v582_v35 = vand.u32 2147483648, %v1982_v28 }
 0x42e   :  { %2387 = vrsqrt.f32 %v561_v30  ;;  %v584_v53 = vadd.f32 0.5, %v561_v30  ;;  %vm572_vm9 = vcmp.eq.f32.partialorder %v561_v30, inf  ;;  %v575_v36 = vand.u32 2147483648, %v561_v30 }
 0x42f   :  { %2389 = vrcp.f32 %v585_v29  ;;  %vm581_vm3 = vcmp.eq.f32.partialorder %v1982_v28, 0.0  ;;  %vm574_vm14 = vcmp.eq.f32.partialorder %v561_v30, 0.0 }
 0x430   :  { %2391 = vrcp.f32 %v584_v53 }
 0x437   :  { %v2386_v8 = vpop.eup %2385 }
 0x438   :  { %v2388_v31 = vpop.eup %2387  ;;  %v578_v32 = vmul.f32 %v2386_v8, %v1982_v28 }
 0x439   :  { %v571_v33 = vmul.f32 %v2388_v31, %v561_v30  ;;  %v2390_v38 = vpop.eup %2389 }
 0x43a   :  { %v580_v37 = vsel %vm579_vm11, %v1982_v28, %v578_v32  ;;  %v2392_v41 = vpop.eup %2391 }
 0x43b   :  { %v573_v39 = vsel %vm572_vm9, %v561_v30, %v571_v33  ;;  %v583_v40 = vsel %vm581_vm3, %v582_v35, %v580_v37 }
 0x43c   :  { %v576_v42 = vsel %vm574_vm14, %v575_v36, %v573_v39  ;;  %v589_v43 = vmul.f32 %v2390_v38, %v583_v40 }
 0x43d   :  { %v588_v44 = vmul.f32 %v2392_v41, %v576_v42 }
 0x43e   :  { %v674_v45 = vmul.f32 %v1982_v28, %v589_v43 }
 0x43f   :  { %1985 = vmatprep.mubr.msk.f32.mxu0 %vm3210_vm15, %v588_v44  ;;  %v673_v46 = vmul.f32 %v588_v44, %v561_v30 }
 0x440   :  { %1986 = vmatmul.mubr.msk.f32.vlgmr.msra.gmra.mrb[4].mxu0 %vm3211_vm0, %v589_v43  ;;  %v2835_v47 = vmul.f32 %v674_v45, %v589_v43 }
 0x441   :  { %v2837_v48 = vmul.f32 %v673_v46, %v588_v44 }
 0x513   :  { %v1987_v49 = vpop.f32.mrb[4].mxu0 }
 0x514   :  { %v2840_v50 = vmul.f32 %v1987_v49, %v2807_v19  ;;  %v662_v51 = vpop.f32.mrb[5].mxu0 }
 0x515   :  { %v2843_v52 = vmul.f32 %v662_v51, %v2809_v21 }
 0x516 LB: > { %vm3212_vm2 = vcmask 64512   ;;  %v2500_v15 = vmov 1.0   ;;  %v2501_v17 = vmov 0.0|0.0   ;;  %v2502_v33 = vmov 1.0|1.0   ;;  %s1623_s6 = sadd.s32 2, %s2493_s6   ;;  %s2493_s6 = sphi %s2851_s6, %s1623_s6   ;;  %v2489_v57 = vphi %v2849_v57, %v1618_v57   ;;  %v2485_v55 = vphi %v2847_v55, %v1619_v55   ;;  %s2481_s4 = sphi %s2845_s4, %s3231_s4  }
 0x517   : > { %v690_v58 = vsel %vm3212_vm2, %v2489_v57, -inf  ;;  %vm3213_vm6 = vmmov %vm3212_vm2  ;;  %1988 = vmatprep.subr.msk.mxu1 %vm2825_vm8, %v2500_v15  ;;  %vm3218_vm14 = vnez %v3195_v56  ;;  %vm3219_vm15 = vnez %v3197_v63  ;;  %vm2503_vm0 = vmmov 0   ;;  %p684_p9 = scmp.lt.s32.totalorder %s1623_s6, 64 }
 0x518   : > { %691 = vmax.xlane.f32.xlu0 %v690_v58  ;;  %v693_v59 = vsel %vm3213_vm6, %v2485_v55, -inf  ;;  %vm3214_vm7 = vmmov %vm3212_vm2  ;;  %1989 = vmatpush3.msk.msra.mxu1 %vm2825_vm8, %v2500_v15  ;;  %v2504_v35 = vmov 0.0  }
 0x519   : > { %vm3215_vm11 = vmmov %vm3212_vm2  ;;  %2220 = vmatprep.subr.bf16.mxu1 %v2501_v17  ;;  %2028 = vmatprep.subr.mxu0 %v2504_v35 }
 0x51a   : > { %vm3216_vm9 = vmmov %vm3212_vm2  ;;  %2029 = vmatpush3.msk.msra.mxu0 %vm2825_vm8, %v2500_v15  ;;  %2030 = vmatprep.mubr.msk.f32.mxu0 %vm2503_vm0, %v2504_v35 }
 0x51b   : > { %vm3217_vm3 = vmmov %vm3212_vm2  ;;  %2245 = vmatprep.subr.msk.bf16.mxu0 %vm2688_vm12, %v2502_v33  ;;  %vm821_vm2 = vcmask 1041409  }
 0x51c   : > { %694 = vmax.xlane.f32.xlu0 %v693_v59 }
 0x5a5   : > { %v692_v60 = vpop.xlane.xlu0 %691 }
 0x5a6   : > { %v696_v61 = vmax.f32 %v692_v60, 0.0 }
 0x5a8   : > { %v698_v62 = vsub.f32 %v2489_v57, %v696_v61  ;;  %v704_v18 = vsub.f32 0.0, %v696_v61 }
 0x5a9   : > { %v695_v0 = vpop.xlane.xlu0 %694 }
 0x5aa   : > { %v700_v1 = vmul.f32 1.442695, %v698_v62  ;;  %v697_v2 = vmax.f32 %v695_v0, 0.0  ;;  %v706_v20 = vmul.f32 1.442695, %v704_v18 }
 0x5ac   : > { %2393 = vpow2.f32 %v700_v1  ;;  %v699_v3 = vsub.f32 %v2485_v55, %v697_v2  ;;  %v705_v22 = vsub.f32 0.0, %v697_v2 }
 0x5ae   : > { %v702_v5 = vmul.f32 1.442695, %v699_v3  ;;  %v708_v23 = vmul.f32 1.442695, %v705_v22 }
 0x5b0   : > { %2395 = vpow2.f32 %v702_v5 }
 0x5b1   : > { %2397 = vpow2.f32 %v706_v20 }
 0x5b2   : > { %2399 = vpow2.f32 %v708_v23 }
 0x5b6   : > { %v2394_v7 = vpop.eup %2393 }
 0x5b7   : > { %v710_v11 = vsel %vm3214_vm7, %v2394_v7, 0.0 }
 0x5b8   : > { %711 = vadd.xlane.f32.xlu1 %v710_v11 }
 0x5ba   : > { %v2396_v13 = vpop.eup %2395 }
 0x5bb   : > { %v713_v14 = vsel %vm3215_vm11, %v2396_v13, 0.0  ;;  %v2398_v24 = vpop.eup %2397  ;;  %vm3220_vm11 = vmmov %vm3217_vm3 }
 0x5bc   : > { %714 = vadd.xlane.f32.xlu1 %v713_v14  ;;  %v2400_v28 = vpop.eup %2399 }
 0x645   : > { %v712_v25 = vpop.xlane.xlu1 %711 }
 0x646   : > { %v716_v27 = vadd.f32 %v2398_v24, %v712_v25 }
 0x648   : > { %2401 = vrcp.f32 %v716_v27 }
 0x649   : > { %v715_v29 = vpop.xlane.xlu1 %714 }
 0x64a   : > { %v717_v30 = vadd.f32 %v2400_v28, %v715_v29 }
 0x64c   : > { %2403 = vrcp.f32 %v717_v30 }
 0x652   : > { %v2402_v53 = vpop.eup %2401 }
 0x653   : > { %v720_v8 = vmul.f32 %v2402_v53, %v2394_v7 }
 0x655   : > { %1990 = vmatprep.mubr.msk.f32.mxu1 %vm3216_vm9, %v720_v8 }
 0x656   : > { %v2404_v31 = vpop.eup %2403 }
 0x657   : > { %v721_v32 = vmul.f32 %v2404_v31, %v2396_v13 }
 0x659   : > { %1991 = vmatmul.mubr.msk.f32.vlgmr.msra.gmra.mrb[0].mxu1 %vm3217_vm3, %v721_v32 }
 0x65a   : > { %2222 = vmatpush3.bf16.msk.msra.mxu1 %vm2688_vm12, %v2502_v33  ;;  %2025 = vmatprep.mubr.msk.f32.mxu1 %vm2503_vm0, %v2504_v35 }
 0x65b   : > { %2223 = vmatprep.subr.bf16.mxu1 %v2501_v17 }
 0x65e   : > { %2225 = vmatpush3.bf16.msk.msra.mxu1 %vm3218_vm14, %v2502_v33 }
 0x65f   : > { %2226 = vmatprep.subr.bf16.mxu1 %v2501_v17 }
 0x662   : > { %2228 = vmatpush3.bf16.msk.msra.mxu1 %vm3219_vm15, %v2502_v33 }
 0x663   : > { %2229 = vmatprep.subr.bf16.mxu1 %v2501_v17 }
 0x666   : > { %2231 = vmatpush3.bf16.msk.msra.mxu1 %vm2745_vm13, %v2502_v33 }
 0x667   : > { %2232 = vmatprep.subr.bf16.mxu1 %v2501_v17 }
 0x66a   : > { %2234 = vmatpush3.bf16.msk.msra.mxu1 %vm2753_vm4, %v2502_v33 }
 0x66b   : > { %2235 = vmatprep.subr.bf16.mxu1 %v2501_v17 }
 0x66e   : > { %2237 = vmatpush3.bf16.msk.msra.mxu1 %vm2767_vm10, %v2502_v33 }
 0x66f   : > { %2238 = vmatprep.subr.bf16.mxu1 %v2501_v17 }
 0x672   : > { %2240 = vmatpush3.bf16.msk.msra.mxu1 %vm2777_vm1, %v2502_v33 }
 0x673   : > { %2241 = vmatprep.subr.bf16.mxu1 %v2501_v17 }
 0x676   : > { %2243 = vmatpush3.bf16.msk.msra.mxu1 %vm2794_vm5, %v2502_v33 }
 0x677   : > { %2068 = vmatprep.subr.msk.mxu1 %vm2825_vm8, %v2500_v15 }
 0x72c   : > { %v1992_v36 = vpop.f32.mrb[0].mxu1 }
 0x72d   : > { %v804_v37 = vmul.f32 %v1992_v36, %v2807_v19  ;;  %v794_v38 = vpop.f32.mrb[1].mxu1 }
 0x72e   : > { %v803_v39 = vmul.f32 %v794_v38, %v2809_v21 }
 0x72f   : > { %v811_v40 = vrot.slane %v804_v37, 4 }
 0x730   : > { %v805_v41 = vrot.slane %v803_v39, 4 }
 0x731   : > { %v812_v42 = vadd.f32 %v811_v40, %v804_v37 }
 0x732   : > { %v806_v43 = vadd.f32 %v805_v41, %v803_v39 }
 0x733   : > { %v813_v44 = vrot.slane %v812_v42, 2 }
 0x734   : > { %v807_v45 = vrot.slane %v806_v43, 2 }
 0x735   : > { %v814_v46 = vadd.f32 %v813_v44, %v812_v42 }
 0x736   : > { %v808_v49 = vadd.f32 %v807_v45, %v806_v43 }
 0x737   : > { %v815_v51 = vrot.slane %v814_v46, 1 }
 0x738   : > { %v809_v58 = vrot.slane %v808_v49, 1 }
 0x739   : > { %v816_v59 = vadd.f32 %v815_v51, %v814_v46 }
 0x73a   : > { %v810_v60 = vadd.f32 %v809_v58, %v808_v49 }
 0x73b   : > { %v818_v61 = vmul.f32 %v816_v59, %v816_v59 }
 0x73c   : > { %v817_v62 = vmul.f32 %v810_v60, %v810_v60 }
 0x73e   : > { %v822_v0 = vsel %vm821_vm2, %v818_v61, %v817_v62 }
 0x73f   : > { %2026 = vmatmul.mubr.f32.vlgmr.msra.gmra.mrb[2].mxu1 %v822_v0 }
 0x740   : > { %2069 = vmatpush3.msk.msra.mxu1 %vm2825_vm8, %v2500_v15 }
 0x741   : > { %2276 = vmatprep.subr.bf16.mxu1 %v2501_v17 }
 0x812   : > { %v2934_v1 = vpop.f32.mrb[2].mxu1 }
 0x813   : > { %v2027_v2 = vpop.f32.mrb[3].mxu1  ;;  %2405 = vrsqrt.f32 %v2934_v1  ;;  %v901_v3 = vadd.f32 0.5, %v2934_v1  ;;  %vm896_vm6 = vcmp.eq.f32.partialorder %v2934_v1, inf  ;;  %v899_v11 = vand.u32 2147483648, %v2934_v1 }
 0x814   : > { %vm898_vm7 = vcmp.eq.f32.partialorder %v2934_v1, 0.0 }
 0x815   : > { %2407 = vrcp.f32 %v901_v3 }
 0x81d   : > { %v2406_v5 = vpop.eup %2405 }
 0x81e   : > { %v895_v7 = vmul.f32 %v2406_v5, %v2934_v1 }
 0x81f   : > { %v2408_v14 = vpop.eup %2407 }
 0x820   : > { %v897_v13 = vsel %vm896_vm6, %v2934_v1, %v895_v7 }
 0x821   : > { %v900_v18 = vsel %vm898_vm7, %v899_v11, %v897_v13 }
 0x822   : > { %v903_v20 = vmul.f32 %v2408_v14, %v900_v18 }
 0x824   : > { %2031 = vmatmul.mubr.msk.f32.vlgmr.msra.gmra.mrb[0].mxu0 %vm3220_vm11, %v903_v20  ;;  %v983_v22 = vmul.f32 %v903_v20, %v2934_v1 }
 0x825   : > { %2247 = vmatpush3.bf16.msk.msra.mxu0 %vm2688_vm12, %v2502_v33 }
 0x826   : > { %2249 = vmatprep.subr.msk.bf16.mxu0 %vm3218_vm14, %v2502_v33  ;;  %v984_v23 = vmul.f32 %v983_v22, %v903_v20 }
 0x828   : > { %v1077_v32 = vrot.slane %v984_v23, %v2665_v12 }
 0x829   : > { %2251 = vmatpush3.bf16.msk.msra.mxu0 %vm3218_vm14, %v2502_v33 }
 0x82a   : > { %2253 = vmatprep.subr.msk.bf16.mxu0 %vm3219_vm15, %v2502_v33  ;;  %v1078_v36 = vcombine.high %v1077_v32, %v1077_v32  ;;  %v1085_v38 = vrot.slane %v1077_v32, %v2665_v12 }
 0x82c   : > { %v1092_v37 = vrot.slane %v1078_v36, %v2665_v12  ;;  %v1096_v40 = vrot.slane %v1085_v38, %v2646_v54 }
 0x82d   : > { %2255 = vmatpush3.bf16.msk.msra.mxu0 %vm3219_vm15, %v2502_v33 }
 0x82e   : > { %2257 = vmatprep.subr.msk.bf16.mxu0 %vm2745_vm13, %v2502_v33  ;;  %v1100_v39 = vrot.slane %v1092_v37, %v2646_v54  ;;  %v1103_v44 = vadd.f32 %v1096_v40, %v2837_v48 }
 0x831   : > { %2259 = vmatpush3.bf16.msk.msra.mxu0 %vm2745_vm13, %v2502_v33 }
 0x832   : > { %2261 = vmatprep.subr.msk.bf16.mxu0 %vm2753_vm4, %v2502_v33 }
 0x835   : > { %2263 = vmatpush3.bf16.msk.msra.mxu0 %vm2753_vm4, %v2502_v33 }
 0x836   : > { %2265 = vmatprep.subr.msk.bf16.mxu0 %vm2767_vm10, %v2502_v33 }
 0x839   : > { %2267 = vmatpush3.bf16.msk.msra.mxu0 %vm2767_vm10, %v2502_v33 }
 0x83a   : > { %2269 = vmatprep.subr.msk.bf16.mxu0 %vm2777_vm1, %v2502_v33 }
 0x83d   : > { %2271 = vmatpush3.bf16.msk.msra.mxu0 %vm2777_vm1, %v2502_v33 }
 0x83e   : > { %2273 = vmatprep.subr.msk.bf16.mxu0 %vm2794_vm5, %v2502_v33 }
 0x841   : > { %2275 = vmatpush3.bf16.msk.msra.mxu0 %vm2794_vm5, %v2502_v33 }
 0x842   : > { %2108 = vmatprep.subr.mxu0 %v2504_v35 }
 0x8f7   : > { %v973_v24 = vpop.f32.mrb[0].mxu0 }
 0x8f8   : > { %v978_v25 = vrot.slane %v973_v24, 1  ;;  %v981_v27 = vmul.f32 %v973_v24, %v810_v60  ;;  %v2032_v28 = vpop.f32.mrb[1].mxu0 }
 0x8fa   : > { %v982_v29 = vmul.f32 %v978_v25, %v816_v59  ;;  %v988_v30 = vrot.slane %v981_v27, %v2646_v54 }
 0x8fc   : > { %v992_v53 = vrot.slane %v982_v29, %v2646_v54  ;;  %v993_v8 = vmul.f32 %v988_v30, %v2843_v52 }
 0x8fe   : > { %v994_v31 = vmul.f32 %v992_v53, %v2840_v50  ;;  %2065 = vmatprep.mubr.f32.mxu0 %v993_v8 }
 0x900   : > { %2066 = vmatmul.mubr.f32.vlgmr.msra.gmra.mrb[2].mxu0 %v994_v31 }
 0x901   : > { %2109 = vmatpush3.msk.msra.mxu0 %vm2825_vm8, %v2500_v15  ;;  %2110 = vmatprep.mubr.msk.f32.mxu0 %vm2503_vm0, %v2504_v35  ;;  %v1104_v15 = vadd.f32 %v1100_v39, %v2835_v47 }
 0x902   : > { %2301 = vmatprep.subr.msk.bf16.mxu0 %vm2688_vm12, %v2502_v33 }
 0x9d3   : > { %v2067_v41 = vpop.f32.mrb[2].mxu0 }
 0x9d4   : > { %v1106_v42 = vmul.f32 2.0, %v2067_v41  ;;  %v1061_v43 = vpop.f32.mrb[3].mxu0 }
 0x9d5   : > { %v1105_v45 = vmul.f32 2.0, %v1061_v43 }
 0x9d6   : > { %v1108_v46 = vsub.f32 %v1104_v15, %v1106_v42 }
 0x9d7   : > { %v1107_v49 = vsub.f32 %v1103_v44, %v1105_v45 }
 0x9d8   : > { %v1110_v51 = vmax.f32 %v1108_v46, 0.0 }
 0x9d9   : > { %v1109_v58 = vmax.f32 %v1107_v49, 0.0 }
 0x9da   : > { %2409 = vrsqrt.f32 %v1110_v51  ;;  %vm1120_vm9 = vcmp.eq.f32.partialorder %v1110_v51, inf  ;;  %v1123_v0 = vand.u32 2147483648, %v1110_v51  ;;  %vm1122_vm3 = vcmp.eq.f32.partialorder %v1110_v51, 0.0 }
 0x9db   : > { %2411 = vrsqrt.f32 %v1109_v58  ;;  %vm1113_vm6 = vcmp.eq.f32.partialorder %v1109_v58, inf  ;;  %v1116_v3 = vand.u32 2147483648, %v1109_v58  ;;  %vm1115_vm7 = vcmp.eq.f32.partialorder %v1109_v58, 0.0 }
 0x9e4   : > { %v2410_v59 = vpop.eup %2409 }
 0x9e5   : > { %v2412_v60 = vpop.eup %2411  ;;  %v1119_v61 = vmul.f32 %v2410_v59, %v1110_v51 }
 0x9e6   : > { %v1112_v62 = vmul.f32 %v2412_v60, %v1109_v58 }
 0x9e7   : > { %v1121_v2 = vsel %vm1120_vm9, %v1110_v51, %v1119_v61  ;;  %vm3221_vm9 = vmmov %vm3220_vm11 }
 0x9e8   : > { %v1124_v5 = vsel %vm1122_vm3, %v1123_v0, %v1121_v2  ;;  %v1114_v7 = vsel %vm1113_vm6, %v1109_v58, %v1112_v62  ;;  %vm3222_vm3 = vmmov %vm3221_vm9 }
 0x9e9   : > { %v1126_v11 = vsub.f32 1.0, %v1124_v5  ;;  %v1117_v13 = vsel %vm1115_vm7, %v1116_v3, %v1114_v7  ;;  %vm3223_vm6 = vmmov %vm3222_vm3 }
 0x9ea   : > { %v1125_v14 = vsub.f32 1.0, %v1117_v13  ;;  %vm3224_vm7 = vmmov %vm3222_vm3 }
 0x9eb   : > { %v3011_v18 = vadd.f32 %v2485_v55, %v1126_v11 }
 0x9ec   : > { %v3014_v20 = vadd.f32 %v2489_v57, %v1125_v14 }
 0x9ed   : > { %v1156_v22 = vsel %vm3220_vm11, %v3011_v18, -inf  ;;  %v1130_v23 = vmul.f32 %v3011_v18, %v1126_v11  ;;  %vm3225_vm11 = vmmov %vm3222_vm3 }
 0x9ee   : > { %1157 = vmax.xlane.f32.xlu1 %v1156_v22  ;;  %v1153_v24 = vsel %vm3221_vm9, %v3014_v20, -inf  ;;  %v1129_v25 = vmul.f32 %v3014_v20, %v1125_v14  ;;  %vm3226_vm9 = vmmov %vm3222_vm3 }
 0x9ef   : > { %1154 = vmax.xlane.f32.xlu0 %v1153_v24  ;;  %v1132_v27 = vsel %vm3222_vm3, %v1130_v23, 0.0 }
 0x9f0   : > { %v1131_v55 = vsel %vm3223_vm6, %v1129_v25, 0.0 }
 0x9f1   : > { %v1133_v28 = vadd.f32 %v1132_v27, %v1131_v55 }
 0xa7b   : > { %v1158_v29 = vpop.xlane.xlu1 %1157 }
 0xa7c   : > { %v1160_v57 = vmax.f32 %v1158_v29, 0.0  ;;  %v1155_v30 = vpop.xlane.xlu0 %1154 }
 0xa7d   : > { %v1159_v53 = vmax.f32 %v1155_v30, 0.0 }
 0xa7e   : > { %v1162_v8 = vsub.f32 %v3011_v18, %v1160_v57  ;;  %v1168_v41 = vsub.f32 0.0, %v1160_v57 }
 0xa7f   : > { %v1161_v31 = vsub.f32 %v3014_v20, %v1159_v53  ;;  %v1167_v15 = vsub.f32 0.0, %v1159_v53 }
 0xa80   : > { %v1165_v32 = vmul.f32 1.442695, %v1162_v8  ;;  %v1171_v42 = vmul.f32 1.442695, %v1168_v41 }
 0xa81   : > { %v1163_v36 = vmul.f32 1.442695, %v1161_v31  ;;  %v1169_v43 = vmul.f32 1.442695, %v1167_v15 }
 0xa82   : > { %2413 = vpow2.f32 %v1165_v32 }
 0xa83   : > { %2415 = vpow2.f32 %v1163_v36 }
 0xa84   : > { %2417 = vpow2.f32 %v1171_v42 }
 0xa85   : > { %2419 = vpow2.f32 %v1169_v43 }
 0xa8c   : > { %v2414_v37 = vpop.eup %2413 }
 0xa8d   : > { %v1176_v38 = vsel %vm3224_vm7, %v2414_v37, 0.0  ;;  %v2416_v39 = vpop.eup %2415  ;;  %vm3228_vm7 = vmmov %vm3222_vm3 }
 0xa8e   : > { %1177 = vadd.xlane.f32.xlu1 %v1176_v38  ;;  %v1173_v40 = vsel %vm3225_vm11, %v2416_v39, 0.0  ;;  %v2418_v44 = vpop.eup %2417 }
 0xa8f   : > { %1174 = vadd.xlane.f32.xlu0 %v1173_v40  ;;  %v2420_v49 = vpop.eup %2419 }
 0xa93   : > { %1134 = vadd.xlane.f32.xlu0 %v1133_v28 }
 0xb1b   : > { %v1178_v45 = vpop.xlane.xlu1 %1177 }
 0xb1c   : > { %v1180_v46 = vadd.f32 %v2418_v44, %v1178_v45  ;;  %v1175_v51 = vpop.xlane.xlu0 %1174 }
 0xb1d   : > { %v1179_v58 = vadd.f32 %v2420_v49, %v1175_v51 }
 0xb1e   : > { %2421 = vrcp.f32 %v1180_v46 }
 0xb1f   : > { %2423 = vrcp.f32 %v1179_v58 }
 0xb20   : > { %v1135_v59 = vpop.xlane.xlu0 %1134 }
 0xb21   : > { %v1136_v60 = vrot.slane %v1135_v59, 4 }
 0xb23   : > { %v1137_v61 = vadd.f32 %v1136_v60, %v1135_v59 }
 0xb25   : > { %v1138_v62 = vrot.slane %v1137_v61, 2 }
 0xb27   : > { %v1139_v0 = vadd.f32 %v1138_v62, %v1137_v61 }
 0xb28   : > { %v2422_v2 = vpop.eup %2421 }
 0xb29   : > { %v2424_v3 = vpop.eup %2423  ;;  %v1140_v5 = vrot.slane %v1139_v0, 1  ;;  %v1184_v13 = vmul.f32 %v2422_v2, %v2414_v37 }
 0xb2a   : > { %v1183_v7 = vmul.f32 %v2424_v3, %v2416_v39 }
 0xb2b   : > { %v1141_v11 = vadd.f32 %v1140_v5, %v1139_v0 }
 0xb2c   : > { %2070 = vmatprep.mubr.msk.f32.mxu1 %vm3226_vm9, %v1183_v7 }
 0xb2d   : > { %2332 = vpush %v1141_v11  ;;  %2071 = vmatmul.mubr.msk.f32.vlgmr.msra.gmra.mrb[4].mxu1 %vm3222_vm3, %v1184_v13 }
 0xb2e   : > { %2278 = vmatpush3.bf16.msk.msra.mxu1 %vm2688_vm12, %v2502_v33  ;;  %2105 = vmatprep.mubr.msk.f32.mxu1 %vm2503_vm0, %v2504_v35 }
 0xb2f   : > { %2279 = vmatprep.subr.bf16.mxu1 %v2501_v17 }
 0xb32   : > { %2281 = vmatpush3.bf16.msk.msra.mxu1 %vm3218_vm14, %v2502_v33 }
 0xb33   : > { %2282 = vmatprep.subr.bf16.mxu1 %v2501_v17 }
 0xb36   : > { %2284 = vmatpush3.bf16.msk.msra.mxu1 %vm3219_vm15, %v2502_v33 }
 0xb37   : > { %2285 = vmatprep.subr.bf16.mxu1 %v2501_v17 }
 0xb3a   : > { %2287 = vmatpush3.bf16.msk.msra.mxu1 %vm2745_vm13, %v2502_v33 }
 0xb3b   : > { %2288 = vmatprep.subr.bf16.mxu1 %v2501_v17 }
 0xb3e   : > { %2290 = vmatpush3.bf16.msk.msra.mxu1 %vm2753_vm4, %v2502_v33 }
 0xb3f   : > { %2291 = vmatprep.subr.bf16.mxu1 %v2501_v17 }
 0xb42   : > { %2293 = vmatpush3.bf16.msk.msra.mxu1 %vm2767_vm10, %v2502_v33 }
 0xb43   : > { %2294 = vmatprep.subr.bf16.mxu1 %v2501_v17 }
 0xb46   : > { %2296 = vmatpush3.bf16.msk.msra.mxu1 %vm2777_vm1, %v2502_v33 }
 0xb47   : > { %2297 = vmatprep.subr.bf16.mxu1 %v2501_v17 }
 0xb4a   : > { %2299 = vmatpush3.bf16.msk.msra.mxu1 %vm2794_vm5, %v2502_v33 }
 0xb5e   : > { %s2333_s8 = spop %2332 }
 0xb5f   : > { %s1143_s9 = smul.f32 0.5, %s2333_s8 }
 0xb61   : > { %v1144_v35 = vstv %s1143_s9 }
 0xb62   : > { %2425 = vlog2.f32 %v1144_v35 }
 0xb6c   : > { %v2426_v14 = vpop.eup %2425 }
 0xb6d   : > { %v1146_v22 = vmul.f32 0.6931472, %v2426_v14 }
 0xb6f   : > { %2334 = vpush %v1146_v22 }
 0xba0   : > { %s3066_s10 = spop %2334 }
 0xba1   : > { %s1148_s11 = ssub.f32 %s3066_s10, %s2481_s4 }
 0xba3   : > { %p1149_p0 = scmp.gt.f32.partialorder %s1148_s11, -0.05  ;;  %p1150_p1 = scmp.lt.f32.partialorder %s1148_s11, 0.05 }
 0xba5   : > { %p3070_p2 = pnand %p1150_p1, %p1149_p0 }
 0xba7   : > { %s1786_s13 = scalar_select %p3070_p2, 0, 1 }
 0xba8   : > { %p1152_p6 = pneg %p3070_p2 }
 0xba9   : > { %v3076_v41 = vstv %s1786_s13 }
 0xbaa   : > { %vm1617_vm0 = vcmp.eq.s32.totalorder %v3076_v41, 1 }
 0xc00   : > { %v2072_v23 = vpop.f32.mrb[4].mxu1 }
 0xc01   : > { %v1267_v24 = vmul.f32 %v2072_v23, %v2807_v19  ;;  %v1257_v25 = vpop.f32.mrb[5].mxu1 }
 0xc02   : > { %v1266_v27 = vmul.f32 %v1257_v25, %v2809_v21 }
 0xc03   : > { %v1274_v55 = vrot.slane %v1267_v24, 4 }
 0xc04   : > { %v1268_v28 = vrot.slane %v1266_v27, 4 }
 0xc05   : > { %v1275_v17 = vadd.f32 %v1274_v55, %v1267_v24 }
 0xc06   : > { %v1269_v29 = vadd.f32 %v1268_v28, %v1266_v27 }
 0xc07   : > { %v1276_v57 = vrot.slane %v1275_v17, 2 }
 0xc08   : > { %v1270_v30 = vrot.slane %v1269_v29, 2 }
 0xc09   : > { %v1277_v53 = vadd.f32 %v1276_v57, %v1275_v17 }
 0xc0a   : > { %v1271_v8 = vadd.f32 %v1270_v30, %v1269_v29 }
 0xc0b   : > { %v1278_v31 = vrot.slane %v1277_v53, 1 }
 0xc0c   : > { %v1272_v32 = vrot.slane %v1271_v8, 1 }
 0xc0d   : > { %v1279_v36 = vadd.f32 %v1278_v31, %v1277_v53 }
 0xc0e   : > { %v1273_v37 = vadd.f32 %v1272_v32, %v1271_v8 }
 0xc0f   : > { %v1281_v38 = vmul.f32 %v1279_v36, %v1279_v36 }
 0xc10   : > { %v1280_v39 = vmul.f32 %v1273_v37, %v1273_v37 }
 0xc12   : > { %v1284_v40 = vsel %vm821_vm2, %v1281_v38, %v1280_v39 }
 0xc13   : > { %2106 = vmatmul.mubr.f32.vlgmr.msra.gmra.mrb[6].mxu1 %v1284_v40 }
 0xce6   : > { %v1352_v15 = vpop.f32.mrb[6].mxu1 }
 0xce7   : > { %2427 = vrsqrt.f32 %v1352_v15  ;;  %v2107_v42 = vpop.f32.mrb[7].mxu1  ;;  %v1363_v43 = vadd.f32 0.5, %v1352_v15  ;;  %v3082_v44 = vsel %vm1617_vm0, %v2934_v1, %v1352_v15  ;;  %vm1358_vm2 = vcmp.eq.f32.partialorder %v1352_v15, inf }
 0xce8   : > { %v1361_v49 = vand.u32 2147483648, %v1352_v15  ;;  %vm1360_vm6 = vcmp.eq.f32.partialorder %v1352_v15, 0.0 }
 0xce9   : > { %2429 = vrcp.f32 %v1363_v43 }
 0xcf1   : > { %v2428_v45 = vpop.eup %2427 }
 0xcf2   : > { %v1357_v46 = vmul.f32 %v2428_v45, %v1352_v15 }
 0xcf3   : > { %v2430_v58 = vpop.eup %2429 }
 0xcf4   : > { %v1359_v51 = vsel %vm1358_vm2, %v1352_v15, %v1357_v46 }
 0xcf5   : > { %v1362_v59 = vsel %vm1360_vm6, %v1361_v49, %v1359_v51  ;;  %vm3229_vm6 = vmmov %vm3228_vm7 }
 0xcf6   : > { %v1365_v60 = vmul.f32 %v2430_v58, %v1362_v59 }
 0xcf8   : > { %2111 = vmatmul.mubr.msk.f32.vlgmr.msra.gmra.mrb[4].mxu0 %vm3228_vm7, %v1365_v60  ;;  %v1445_v61 = vmul.f32 %v1365_v60, %v1352_v15  ;;  %vm3230_vm7 = vmmov %vm3229_vm6 }
 0xcf9   : > { %2303 = vmatpush3.bf16.msk.msra.mxu0 %vm2688_vm12, %v2502_v33 }
 0xcfa   : > { %2305 = vmatprep.subr.msk.bf16.mxu0 %vm3218_vm14, %v2502_v33  ;;  %v1446_v1 = vmul.f32 %v1445_v61, %v1365_v60 }
 0xcfc   : > { %v1539_v14 = vrot.slane %v1446_v1, %v2665_v12 }
 0xcfd   : > { %2307 = vmatpush3.bf16.msk.msra.mxu0 %vm3218_vm14, %v2502_v33 }
 0xcfe   : > { %2309 = vmatprep.subr.msk.bf16.mxu0 %vm3219_vm15, %v2502_v33  ;;  %v1540_v22 = vcombine.high %v1539_v14, %v1539_v14  ;;  %v1547_v23 = vrot.slane %v1539_v14, %v2665_v12 }
 0xd00   : > { %v1558_v25 = vrot.slane %v1547_v23, %v2646_v54 }
 0xd01   : > { %2311 = vmatpush3.bf16.msk.msra.mxu0 %vm3219_vm15, %v2502_v33 }
 0xd02   : > { %2313 = vmatprep.subr.msk.bf16.mxu0 %vm2745_vm13, %v2502_v33  ;;  %v1565_v29 = vadd.f32 %v1558_v25, %v2837_v48 }
 0xd05   : > { %2315 = vmatpush3.bf16.msk.msra.mxu0 %vm2745_vm13, %v2502_v33 }
 0xd06   : > { %2317 = vmatprep.subr.msk.bf16.mxu0 %vm2753_vm4, %v2502_v33 }
 0xd09   : > { %2319 = vmatpush3.bf16.msk.msra.mxu0 %vm2753_vm4, %v2502_v33 }
 0xd0a   : > { %2321 = vmatprep.subr.msk.bf16.mxu0 %vm2767_vm10, %v2502_v33 }
 0xd0d   : > { %2323 = vmatpush3.bf16.msk.msra.mxu0 %vm2767_vm10, %v2502_v33 }
 0xd0e   : > { %2325 = vmatprep.subr.msk.bf16.mxu0 %vm2777_vm1, %v2502_v33 }
 0xd11   : > { %2327 = vmatpush3.bf16.msk.msra.mxu0 %vm2777_vm1, %v2502_v33 }
 0xd12   : > { %2329 = vmatprep.subr.msk.bf16.mxu0 %vm2794_vm5, %v2502_v33 }
 0xd15   : > { %2331 = vmatpush3.bf16.msk.msra.mxu0 %vm2794_vm5, %v2502_v33  ;;  %v1554_v33 = vrot.slane %v1540_v22, %v2665_v12 }
 0xd17   : > { %v1562_v24 = vrot.slane %v1554_v33, %v2646_v54 }
 0xd19   : > { %v1566_v55 = vadd.f32 %v1562_v24, %v2835_v47 }
 0xdcb   : > { %v1435_v62 = vpop.f32.mrb[4].mxu0 }
 0xdcc   : > { %v1440_v0 = vrot.slane %v1435_v62, 1  ;;  %v1443_v2 = vmul.f32 %v1435_v62, %v1273_v37  ;;  %v2112_v3 = vpop.f32.mrb[5].mxu0 }
 0xdce   : > { %v1444_v5 = vmul.f32 %v1440_v0, %v1279_v36  ;;  %v1450_v7 = vrot.slane %v1443_v2, %v2646_v54 }
 0xdd0   : > { %v1454_v11 = vrot.slane %v1444_v5, %v2646_v54  ;;  %v1455_v13 = vmul.f32 %v1450_v7, %v2843_v52 }
 0xdd2   : > { %v1456_v35 = vmul.f32 %v1454_v11, %v2840_v50  ;;  %2145 = vmatprep.mubr.f32.mxu0 %v1455_v13 }
 0xdd4   : > { %2146 = vmatmul.mubr.f32.vlgmr.msra.gmra.mrb[6].mxu0 %v1456_v35 }
 0xea7   : > { %v2147_v27 = vpop.f32.mrb[6].mxu0 }
 0xea8   : > { %v1568_v28 = vmul.f32 2.0, %v2147_v27  ;;  %v1523_v17 = vpop.f32.mrb[7].mxu0 }
 0xea9   : > { %v1567_v57 = vmul.f32 2.0, %v1523_v17 }
 0xeaa   : > { %v1570_v30 = vsub.f32 %v1566_v55, %v1568_v28 }
 0xeab   : > { %v1569_v53 = vsub.f32 %v1565_v29, %v1567_v57 }
 0xeac   : > { %v1572_v8 = vmax.f32 %v1570_v30, 0.0 }
 0xead   : > { %v1571_v31 = vmax.f32 %v1569_v53, 0.0 }
 0xeae   : > { %2431 = vrsqrt.f32 %v1572_v8  ;;  %vm1582_vm11 = vcmp.eq.f32.partialorder %v1572_v8, inf  ;;  %v1585_v39 = vand.u32 2147483648, %v1572_v8  ;;  %vm1584_vm3 = vcmp.eq.f32.partialorder %v1572_v8, 0.0 }
 0xeaf   : > { %2433 = vrsqrt.f32 %v1571_v31  ;;  %vm1575_vm9 = vcmp.eq.f32.partialorder %v1571_v31, inf  ;;  %v1578_v40 = vand.u32 2147483648, %v1571_v31  ;;  %vm1577_vm2 = vcmp.eq.f32.partialorder %v1571_v31, 0.0 }
 0xeb8   : > { %v2432_v32 = vpop.eup %2431 }
 0xeb9   : > { %v2434_v36 = vpop.eup %2433  ;;  %v1581_v37 = vmul.f32 %v2432_v32, %v1572_v8 }
 0xeba   : > { %v1574_v38 = vmul.f32 %v2434_v36, %v1571_v31 }
 0xebb   : > { %v1583_v15 = vsel %vm1582_vm11, %v1572_v8, %v1581_v37 }
 0xebc   : > { %v1576_v42 = vsel %vm1575_vm9, %v1571_v31, %v1574_v38  ;;  %v1586_v43 = vsel %vm1584_vm3, %v1585_v39, %v1583_v15 }
 0xebd   : > { %v1579_v45 = vsel %vm1577_vm2, %v1578_v40, %v1576_v42  ;;  %v1588_v46 = vsub.f32 1.0, %v1586_v43 }
 0xebe   : > { %v1587_v49 = vsub.f32 1.0, %v1579_v45 }
 0xebf   : > { %v1590_v51 = vadd.f32 %v1588_v46, %v3011_v18 }
 0xec0   : > { %v1589_v58 = vadd.f32 %v1587_v49, %v3014_v20 }
 0xec1   : > { %v1592_v59 = vmul.f32 %v1590_v51, %v1588_v46  ;;  %v1619_v55 = vsel %vm1617_vm0, %v3011_v18, %v1590_v51  }
 0xec2   : > { %v1591_v60 = vmul.f32 %v1589_v58, %v1587_v49  ;;  %v1618_v57 = vsel %vm1617_vm0, %v3014_v20, %v1589_v58  }
 0xec3   : > { %v1594_v61 = vsel %vm3229_vm6, %v1592_v59, 0.0 }
 0xec4   : > { %v1593_v1 = vsel %vm3230_vm7, %v1591_v60, 0.0 }
 0xec5   : > { %v1595_v62 = vadd.f32 %v1594_v61, %v1593_v1 }
 0xec7   : > { %1596 = vadd.xlane.f32.xlu1 %v1595_v62 }
 0xf54   : > { %v1597_v0 = vpop.xlane.xlu1 %1596 }
 0xf55   : > { %v1598_v2 = vrot.slane %v1597_v0, 4 }
 0xf57   : > { %v1599_v3 = vadd.f32 %v1598_v2, %v1597_v0 }
 0xf59   : > { %v1600_v5 = vrot.slane %v1599_v3, 2 }
 0xf5b   : > { %v1601_v7 = vadd.f32 %v1600_v5, %v1599_v3 }
 0xf5d   : > { %v1602_v18 = vrot.slane %v1601_v7, 1 }
 0xf5f   : > { %v1603_v11 = vadd.f32 %v1602_v18, %v1601_v7 }
 0xf61   : > { %2336 = vpush %v1603_v11 }
 0xf92   : > { %s2337_s14 = spop %2336 }
 0xf93   : > { %s1605_s15 = smul.f32 0.5, %s2337_s14 }
 0xf95   : > { %v1606_v20 = vstv %s1605_s15 }
 0xf96   : > { %2435 = vlog2.f32 %v1606_v20 }
 0xfa0   : > { %v2436_v41 = vpop.eup %2435 }
 0xfa1   : > { %v1608_v13 = vmul.f32 0.6931472, %v2436_v41 }
 0xfa3   : > { %2338 = vpush %v1608_v13 }
 0xfd4   : > { %s2339_s16 = spop %2338 }
 0xfd5   : > { %s1610_s17 = ssub.f32 %s2339_s16, %s3066_s10  ;;  %s3233_s16 = smov (!%p3070_p2, %s2339_s16), %s3066_s10 }
 0xfd6   : > { %s3231_s4 = smov %s3233_s16 }
 0xfd7   : > { %p1611_p3 = scmp.gt.f32.partialorder %s1610_s17, -0.05  ;;  %p1612_p4 = scmp.lt.f32.partialorder %s1610_s17, 0.05 }
 0xfd9   : > { %p1613_p5 = pnand %p1612_p4, %p1611_p3 }
 0xfdb   : > { %p1614_p7 = pneg %p1613_p5 }
 0xfdd   : > { %p1622_p8 = por %p1614_p7, %p1152_p6 }
 0xfdf   : > { %s1624_s18 = scalar_select %p1622_p8, 1, 0 }
 0xfe1   : > { %p685_p10 = scmp.eq.s32.totalorder %s1624_s18, 0 }
 0xfe3   : > { %p686_p11 = pnand %p685_p10, %p684_p9 }
 0xfe4   :  { %v1625_v35 = vadd.f32 (%p686_p11), 0.5, %v3082_v44  ;;  %s2505_s0 = smov (%p686_p11), [#allocation2]   ;;  %vm1630_vm0 = vcmask (%p686_p11), 58368  }
 0xfe5   :  { %689 = sbr.rel (!%p686_p11) target bundleno = 1302 (0x516), region = 55  ;;  %s1638_s19 = sshll.u32 (%p686_p11), %s2505_s0, 4  ;;  %s1639_s19 = int_to_ptr.vmem [resolvable:$true] %s1638_s19 }
 0xfe6   :  { %2437 = vrcp.f32 (%p686_p11), %v1625_v35  ;;  %s2439_s20 = scalar_lea.vmem (%p686_p11), %s1639_s19, 32  ;;  %p2444_p13 = scmp.lt.s32.totalorder (%p686_p11), %s1639_s19, %s1639_s19 }
 0xfe7   :  { %p2440_p12 = scmp.ne.s32.totalorder (%p686_p11), %s1639_s19, %s2439_s20  ;;  %p2445_p0 = scmp.lt.s32.totalorder (%p686_p11), %s2439_s20, %s2439_s20 }
 0xfe9   :  { %p2446_p1 = por (%p686_p11), %p2445_p0, %p2444_p13 }
 0xfeb   :  { %p2447_p2 = pnand (%p686_p11), %p2446_p1, %p2440_p12 }
 0xff0   :  { %v2438_v14 = vpop.eup %2437 }
 0xff1   :  { %v1627_v22 = vmul.f32 %v2438_v14, %v3082_v44 }
 0xff3   :  { %v1628_v33 = vmax.f32 %v1627_v22, 1e-06 }
 0xff5   :  { %v1629_v23 = vmin.f32 %v1628_v33, 0.999999 }
 0xff7   :  { %1631 = vst.msk [vmem:[#allocation2] sm:$0x3] %vm1630_vm0, %v1629_v23 }
 0xff8   :  { %2450 = shalt.err (!%p2447_p2)
}
 0xff9   :  { %s2451_s22 = scalar_lea.hbm %s3185_s5, 32 }
 0xffa   :  { %p2452_p3 = scmp.ne.s32.totalorder %s3185_s5, %s2451_s22  ;;  %p2455_p4 = scmp.lt.u32.totalorder %s2451_s22, %s3185_s5 }
 0xffc   :  { %p2457_p5 = pnand %p2455_p4, %p2452_p3 }
 0xffe   :  { %2460 = shalt.err (!%p2457_p5)
}
 0xfff   :  { %1641 = dma.vmem_to_hbm [thread:$0]  %s1639_s19, 32, %s3185_s5, [#allocation3]  }
0x1000   :  { %2477 = dma.done.wait [#allocation3], 32  }
0x1001   :  { %2478 = vsyncadd [#allocation3], 4294967264 }
0x1002   :  { %1649 = vsyncpa [#allocation3], 1 }

</bundles_post_ra>
